<compile_context>
chip_gen: v7x
topology: tpu7x:2x2x1
jax: 0.10.0
libtpu: 0.0.40
codegen_flags: <defaults>
</compile_context>

<pallas_src>
import functools

import jax
import jax.numpy as jnp
from jax import lax
from jax.experimental import pallas as pl
from jax.experimental.pallas import tpu as pltpu

EPS = 1e-5  # nn.GroupNorm default


# ---------------------------------------------------------------------------
# Fused kernel: nb images stacked per grid step, everything stays in VMEM.
# ---------------------------------------------------------------------------
def _residual_block_kernel(x_ref, w1_ref, w2_ref, wd_ref, vecs_ref,
                           gmap_ref, gmapt_ref, o_ref, *, nb, H, inv_n):
    WCi = x_ref.shape[2]
    WCo = o_ref.shape[2]
    R = nb * H                                   # stacked rows (matmul M dim)

    # Image-boundary masks for the dy (height) shifts.  Only needed when more
    # than one image is stacked (the single zero row already pads nb == 1).
    if nb > 1:
        row = lax.broadcasted_iota(jnp.int32, (R, 1), 0)
        top_row = (row % H) == 0                 # first row of each image
        bot_row = (row % H) == (H - 1)           # last row of each image
    else:
        top_row = bot_row = None

    def shift_down(a):   # out[r] = a[r-1] within each image, 0 at image top
        z = jnp.zeros((1, a.shape[1]), a.dtype)
        s = jnp.concatenate([z, a[:-1, :]], axis=0)
        return s if top_row is None else jnp.where(top_row, jnp.zeros_like(s), s)

    def shift_up(a):     # out[r] = a[r+1] within each image, 0 at image bottom
        z = jnp.zeros((1, a.shape[1]), a.dtype)
        s = jnp.concatenate([a[1:, :], z], axis=0)
        return s if bot_row is None else jnp.where(bot_row, jnp.zeros_like(s), s)

    def conv3x3(a, w_ref, bias):
        # a: (R, W*Cin) image-stacked lane-dense rows.  Width taps + channel
        # mixing live in the banded weight; height taps are three accumulating
        # dots (one per dy band) -- no (R, 3*W*Cin) concat buffer.
        a = a.astype(w_ref.dtype)
        acc = jnp.dot(shift_down(a), w_ref[0], preferred_element_type=jnp.float32)
        acc += jnp.dot(a, w_ref[1], preferred_element_type=jnp.float32)
        acc += jnp.dot(shift_up(a), w_ref[2], preferred_element_type=jnp.float32)
        return acc + bias

    def group_norm(z, gamma, beta):
        # z: (R, WCo) f32.  Per-image per-group stats: sublane sums per image,
        # then ONE fused [s1; s2] dot with the lane->group one-hot map and ONE
        # fused [mean; inv] dot back to lanes.
        z3 = z.reshape(nb, H, WCo)
        s1 = jnp.sum(z3, axis=1)                                   # (nb, WCo)
        s2 = jnp.sum(z3 * z3, axis=1)                              # (nb, WCo)
        gs = jnp.dot(jnp.concatenate([s1, s2], axis=0), gmap_ref[...],
                     preferred_element_type=jnp.float32)           # (2*nb, G)
        mean_g = gs[:nb] * inv_n
        var_g = jnp.maximum(gs[nb:] * inv_n - mean_g * mean_g, 0.0)  # clamp >= 0
        inv_g = lax.rsqrt(var_g + EPS)
        lanes = jnp.dot(jnp.concatenate([mean_g, inv_g], axis=0), gmapt_ref[...],
                        preferred_element_type=jnp.float32)        # (2*nb, WCo)
        mean_l = lanes[:nb].reshape(nb, 1, WCo)
        inv_l = lanes[nb:].reshape(nb, 1, WCo)
        zn = (z3 - mean_l) * inv_l
        zn = zn * gamma.reshape(1, 1, WCo) + beta.reshape(1, 1, WCo)
        return zn.reshape(R, WCo)

    vecs = vecs_ref[...]                          # (9, WCo) packed vectors
    b1, g1, be1 = vecs[0:1], vecs[1:2], vecs[2:3]
    b2, g2, be2 = vecs[3:4], vecs[4:5], vecs[5:6]
    bd, g3, be3 = vecs[6:7], vecs[7:8], vecs[8:9]

    x = x_ref[...].reshape(R, WCi)                                 # stacked images
    y = jnp.maximum(group_norm(conv3x3(x, w1_ref, b1), g1, be1), 0.0)
    y = jnp.maximum(group_norm(conv3x3(y, w2_ref, b2), g2, be2), 0.0)
    d = jnp.dot(x.astype(wd_ref.dtype), wd_ref[...],
                preferred_element_type=jnp.float32) + bd
    d = group_norm(d, g3, be3)
    o_ref[...] = jnp.maximum(d + y, 0.0).reshape(nb, H, WCo).astype(o_ref.dtype)


# ---------------------------------------------------------------------------
# Host-side weight / layout preparation (would be cached with the weights).
# ---------------------------------------------------------------------------
def _banded_conv3x3_weight(w_oihw, W):
    """(Cout, Cin, 3, 3) torch conv weight -> (3, W*Cin, W*Cout) banded bands.

    Band dy multiplies input row h-1+dy; inside a band, row = w_in*Cin + ci,
    col = w_out*Cout + co, with absent off-band blocks realising width padding.
    TODO(synk): the banded form is ~3/W dense; for very large W*C switch to a
                per-dx decomposition to avoid the redundant MXU FLOPs/bytes.
    """
    Cout, Cin = w_oihw.shape[0], w_oihw.shape[1]
    w_hwio = jnp.transpose(w_oihw, (2, 3, 1, 0))                  # (3,3,Cin,Cout)
    w_in = jnp.arange(W)[:, None]
    w_out = jnp.arange(W)[None, :]
    dx = w_in - w_out + 1                                         # (W, W)
    valid = ((dx >= 0) & (dx <= 2)).astype(w_oihw.dtype)[..., None, None]
    dx_c = jnp.clip(dx, 0, 2)
    bands = []
    for dy in range(3):
        m = w_hwio[dy][dx_c] * valid                              # (W,W,Cin,Cout)
        m = jnp.transpose(m, (0, 2, 1, 3)).reshape(W * Cin, W * Cout)
        bands.append(m)
    return jnp.stack(bands, axis=0)                               # (3, W*Cin, W*Cout)


def _blockdiag_1x1_weight(w_oihw, W):
    """(Cout, Cin, 1, 1) 1x1 conv weight -> block-diagonal (W*Cin, W*Cout)."""
    wd_io = jnp.transpose(w_oihw[:, :, 0, 0], (1, 0))             # (Cin, Cout)
    m = jnp.einsum("pq,io->piqo", jnp.eye(W, dtype=wd_io.dtype), wd_io)
    return m.reshape(W * wd_io.shape[0], W * wd_io.shape[1])


def _lane_expand(v, W):
    """(C,) per-channel vector -> (1, W*C) lane-dense row (lane = w*C + c)."""
    return jnp.tile(v.reshape(1, -1), (1, W))


def _pick_images_per_step(n, h, mxu_rows=256):
    """Pick how many images to stack per grid step.

    Targets nb*h >= 256 (fills the v6e/v7x MXU; >=128 also covers v5e) while
    keeping >= 2 grid steps when possible so the "parallel" batch axis can be
    split across v7x's two TensorCores.  For tiny batches we prefer >=2 small
    steps (v7x-friendly); on single-core v6e pass images_per_step=N instead.
    """
    divs = [d for d in range(1, n + 1) if n % d == 0]
    full = [d for d in divs if d * h >= mxu_rows and n // d >= 2]
    if full:
        return min(full)
    two_step = [d for d in divs if n // d >= 2]
    if two_step:
        return max(two_step)
    return n


def _const_spec(block_shape, index_map):
    """Grid-invariant operand: single-buffer it (no need to double-buffer
    weights whose index_map is constant across the grid)."""
    try:
        return pl.BlockSpec(block_shape, index_map, pipeline_mode=pl.Buffered(1))
    except TypeError:  # older jax without BlockSpec.pipeline_mode
        return pl.BlockSpec(block_shape, index_map)


def residual_block_forward_lane(x_lane, params, num_groups, *, W,
                                images_per_step=None,
                                matmul_dtype=jnp.float32):
    """Lane-dense entry point.

    x_lane: (N, H, W*Cin) f32/bf16 with lane = w*Cin + c; returns (N, H, W*Cout)
    f32 in the same layout.  Use this directly when chaining residual blocks so
    activations never round-trip through NCHW transposes in HBM.

    matmul_dtype=jnp.bfloat16 halves the HBM/VMEM traffic of the MXU operands
    and is natively supported by the MXU on v5e, v6e and v7x alike; GroupNorm
    stats and all accumulation stay f32 either way.
    """
    N, H, WCi = x_lane.shape
    Cin = WCi // W
    Cout = params["w1"].shape[0]
    G = num_groups
    Cg = Cout // G
    WCo = W * Cout

    w1 = _banded_conv3x3_weight(params["w1"], W)                  # (3, W*Cin, W*Cout)
    w2 = _banded_conv3x3_weight(params["w2"], W)                  # (3, W*Cout, W*Cout)
    wd = _blockdiag_1x1_weight(params["wd"], W)                   # (W*Cin, W*Cout)
    if matmul_dtype != jnp.float32:
        x_lane, w1, w2, wd = (a.astype(matmul_dtype) for a in (x_lane, w1, w2, wd))

    # All nine per-channel vectors packed into one (9, W*Cout) f32 operand.
    vecs = jnp.concatenate(
        [_lane_expand(params[k], W)
         for k in ("b1", "g1", "be1", "b2", "g2", "be2", "bd", "g3", "be3")],
        axis=0)
    gmap_c = (jnp.arange(Cout)[:, None] // Cg ==
              jnp.arange(G)[None, :]).astype(jnp.float32)         # (Cout, G)
    gmap = jnp.tile(gmap_c, (W, 1))                               # (W*Cout, G)
    gmapt = gmap.T                                                # (G, W*Cout)

    nb = images_per_step or _pick_images_per_step(N, H)
    assert N % nb == 0, "images_per_step must divide the batch size"

    kernel = functools.partial(_residual_block_kernel, nb=nb, H=H,
                               inv_n=1.0 / float(H * W * Cg))

    # Explicit VMEM budget: weights single-buffered, in/out double-buffered,
    # plus conv/GN temporaries.  Only raise the limit when actually needed
    # (v7x has 64 MiB physical VMEM vs 128 MiB on v5e/v6e).
    mm_bytes = jnp.dtype(matmul_dtype).itemsize
    budget = ((w1.size + w2.size + wd.size) * mm_bytes
              + (vecs.size + gmap.size + gmapt.size) * 4
              + 2 * nb * H * (WCi * mm_bytes + WCo * 4)
              + 10 * nb * H * WCo * 4)
    vmem_limit = None
    if budget > 32 * 1024 * 1024:
        # TODO(synk): for very large W*C (v7x's 64 MiB VMEM) add a K-tiled grid
        #             axis with an f32 accumulator instead of raising the limit.
        vmem_limit = min(int(budget * 5 // 4), 100 * 1024 * 1024)

    return pl.pallas_call(
        kernel,
        out_shape=jax.ShapeDtypeStruct((N, H, WCo), jnp.float32),
        grid_spec=pltpu.PrefetchScalarGridSpec(
            num_scalar_prefetch=0,
            grid=(N // nb,),
            in_specs=[
                pl.BlockSpec((nb, H, WCi), lambda i: (i, 0, 0)),
                _const_spec((3, WCi, WCo), lambda i: (0, 0, 0)),   # w1 bands
                _const_spec((3, WCo, WCo), lambda i: (0, 0, 0)),   # w2 bands
                _const_spec((WCi, WCo), lambda i: (0, 0)),         # 1x1 downsample
                _const_spec((9, WCo), lambda i: (0, 0)),           # packed b/g/be
                _const_spec((WCo, G), lambda i: (0, 0)),           # lane -> group
                _const_spec((G, WCo), lambda i: (0, 0)),           # group -> lane
            ],
            out_specs=pl.BlockSpec((nb, H, WCo), lambda i: (i, 0, 0)),
        ),
        compiler_params=pltpu.CompilerParams(
            dimension_semantics=("parallel",),
            vmem_limit_bytes=vmem_limit),
    )(x_lane, w1, w2, wd, vecs, gmap, gmapt)


def residual_block_forward(x, params, num_groups, *, images_per_step=None,
                           matmul_dtype=jnp.float32):
    """x: (N, Cin, H, W) NCHW f32 (PyTorch layout). Returns NCHW f32.

    Thin wrapper around residual_block_forward_lane; when chaining blocks,
    prefer the lane-dense entry point so the NCHW<->NHWC transposes (a full
    extra HBM read+write each) happen only at model entry/exit.
    """
    N, Cin, H, W = x.shape
    Cout = params["w1"].shape[0]
    x_lane = jnp.transpose(x, (0, 2, 3, 1)).reshape(N, H, W * Cin)
    out = residual_block_forward_lane(x_lane, params, num_groups, W=W,
                                      images_per_step=images_per_step,
                                      matmul_dtype=matmul_dtype)
    return jnp.transpose(out.reshape(N, H, W, Cout), (0, 3, 1, 2))


# ---------------------------------------------------------------------------
# Pure-JAX reference (mirrors the PyTorch module, NCHW) for verification.
# ---------------------------------------------------------------------------
def residual_block_ref(x, p, num_groups):
    def conv(z, w, b, pad):
        out = lax.conv_general_dilated(
            z, w, window_strides=(1, 1), padding=[(pad, pad), (pad, pad)],
            dimension_numbers=("NCHW", "OIHW", "NCHW"))
        return out + b.reshape(1, -1, 1, 1)

    def gn(z, gamma, beta):
        n, c, h, w = z.shape
        zg = z.reshape(n, num_groups, c // num_groups, h, w)
        mean = zg.mean(axis=(2, 3, 4), keepdims=True)
        var = ((zg - mean) ** 2).mean(axis=(2, 3, 4), keepdims=True)
        zn = ((zg - mean) * lax.rsqrt(var + EPS)).reshape(n, c, h, w)
        return zn * gamma.reshape(1, -1, 1, 1) + beta.reshape(1, -1, 1, 1)

    y = jax.nn.relu(gn(conv(x, p["w1"], p["b1"], 1), p["g1"], p["be1"]))
    y = jax.nn.relu(gn(conv(y, p["w2"], p["b2"], 1), p["g2"], p["be2"]))
    d = gn(conv(x, p["wd"], p["bd"], 0), p["g3"], p["be3"])
    return jax.nn.relu(d + y)


# ---------------------------------------------------------------------------
if __name__ == "__main__":
    N, H, W = 2, 16, 16
    in_planes, planes = 8, 16
    num_groups = planes // 8          # as in the module

    key = jax.random.PRNGKey(0)
    ks = jax.random.split(key, 13)

    def rnd(k, shape, scale=0.1):
        return (scale * jax.random.normal(k, shape)).astype(jnp.float32)

    params = {
        # PyTorch layouts: conv weights OIHW, everything else per-channel vecs
        "w1": rnd(ks[0], (planes, in_planes, 3, 3)),
        "b1": rnd(ks[1], (planes,)),
        "w2": rnd(ks[2], (planes, planes, 3, 3)),
        "b2": rnd(ks[3], (planes,)),
        "wd": rnd(ks[4], (planes, in_planes, 1, 1)),
        "bd": rnd(ks[5], (planes,)),
        "g1": 1.0 + rnd(ks[6], (planes,)),
        "be1": rnd(ks[7], (planes,)),
        "g2": 1.0 + rnd(ks[8], (planes,)),
        "be2": rnd(ks[9], (planes,)),
        "g3": 1.0 + rnd(ks[10], (planes,)),
        "be3": rnd(ks[11], (planes,)),
    }
    x = jax.random.normal(ks[12], (N, in_planes, H, W), dtype=jnp.float32)

    ref = residual_block_ref(x, params, num_groups)

    # Default packing (nb=1 here -> 2 "parallel" grid steps for v7x's 2 TCs).
    out = jax.block_until_ready(residual_block_forward(x, params, num_groups))
    err = float(jnp.max(jnp.abs(out - ref)))
    assert err < 2e-3, f"mismatch vs reference (nb=auto): {err}"

    # Image-stacked path (nb=2 -> one (nb*H, .) dot per conv band, exercises
    # the cross-image boundary masks).
    out2 = jax.block_until_ready(
        residual_block_forward(x, params, num_groups, images_per_step=2))
    err2 = float(jnp.max(jnp.abs(out2 - ref)))
    assert err2 < 2e-3, f"mismatch vs reference (nb=2): {err2}"

    print("KERNEL_OK")
</pallas_src>

<mosaic_0001>
module attributes {stable_mosaic.version = 11 : i64} {
  func.func @_residual_block_kernel(%arg0: i32, %arg1: memref<1x16x128xf32, #tpu.memory_space<vmem>>, %arg2: memref<3x128x256xf32, #tpu.memory_space<vmem>>, %arg3: memref<3x256x256xf32, #tpu.memory_space<vmem>>, %arg4: memref<128x256xf32, #tpu.memory_space<vmem>>, %arg5: memref<9x256xf32, #tpu.memory_space<vmem>>, %arg6: memref<256x2xf32, #tpu.memory_space<vmem>>, %arg7: memref<2x256xf32, #tpu.memory_space<vmem>>, %arg8: memref<1x16x256xf32, #tpu.memory_space<vmem>>) attributes {dimension_semantics = [#tpu.dimension_semantics<parallel>], iteration_bounds = array<i64: 2>, scalar_prefetch = 0 : i64, scratch_operands = 0 : i64, tpu.core_type = #tpu.core_type<tc>, window_params = [{transform_indices = @transform_0, window_bounds = array<i64: 1, 16, 128>}, {pipeline_mode = #tpu.pipeline_mode<synchronous>, transform_indices = @transform_1, window_bounds = array<i64: 3, 128, 256>}, {pipeline_mode = #tpu.pipeline_mode<synchronous>, transform_indices = @transform_2, window_bounds = array<i64: 3, 256, 256>}, {pipeline_mode = #tpu.pipeline_mode<synchronous>, transform_indices = @transform_3, window_bounds = array<i64: 128, 256>}, {pipeline_mode = #tpu.pipeline_mode<synchronous>, transform_indices = @transform_4, window_bounds = array<i64: 9, 256>}, {pipeline_mode = #tpu.pipeline_mode<synchronous>, transform_indices = @transform_5, window_bounds = array<i64: 256, 2>}, {pipeline_mode = #tpu.pipeline_mode<synchronous>, transform_indices = @transform_6, window_bounds = array<i64: 2, 256>}, {transform_indices = @transform_7, window_bounds = array<i64: 1, 16, 256>}]} {
    %c0 = arith.constant 0 : index
    %c0_0 = arith.constant 0 : index
    %0 = vector.load %arg5[%c0, %c0_0] : memref<9x256xf32, #tpu.memory_space<vmem>>, vector<9x256xf32>
    %1 = vector.extract_strided_slice %0 {offsets = [0, 0], sizes = [1, 256], strides = [1, 1]} : vector<9x256xf32> to vector<1x256xf32>
    %2 = vector.extract_strided_slice %0 {offsets = [1, 0], sizes = [1, 256], strides = [1, 1]} : vector<9x256xf32> to vector<1x256xf32>
    %3 = vector.extract_strided_slice %0 {offsets = [2, 0], sizes = [1, 256], strides = [1, 1]} : vector<9x256xf32> to vector<1x256xf32>
    %4 = vector.extract_strided_slice %0 {offsets = [3, 0], sizes = [1, 256], strides = [1, 1]} : vector<9x256xf32> to vector<1x256xf32>
    %5 = vector.extract_strided_slice %0 {offsets = [4, 0], sizes = [1, 256], strides = [1, 1]} : vector<9x256xf32> to vector<1x256xf32>
    %6 = vector.extract_strided_slice %0 {offsets = [5, 0], sizes = [1, 256], strides = [1, 1]} : vector<9x256xf32> to vector<1x256xf32>
    %7 = vector.extract_strided_slice %0 {offsets = [6, 0], sizes = [1, 256], strides = [1, 1]} : vector<9x256xf32> to vector<1x256xf32>
    %8 = vector.extract_strided_slice %0 {offsets = [7, 0], sizes = [1, 256], strides = [1, 1]} : vector<9x256xf32> to vector<1x256xf32>
    %9 = vector.extract_strided_slice %0 {offsets = [8, 0], sizes = [1, 256], strides = [1, 1]} : vector<9x256xf32> to vector<1x256xf32>
    %c0_1 = arith.constant 0 : index
    %c0_2 = arith.constant 0 : index
    %c0_3 = arith.constant 0 : index
    %10 = vector.load %arg1[%c0_1, %c0_2, %c0_3] : memref<1x16x128xf32, #tpu.memory_space<vmem>>, vector<1x16x128xf32>
    %11 = vector.shape_cast %10 : vector<1x16x128xf32> to vector<16x128xf32>
    %cst = arith.constant 0.000000e+00 : f32
    %12 = vector.broadcast %cst : f32 to vector<1x128xf32>
    %13 = vector.extract_strided_slice %11 {offsets = [0, 0], sizes = [15, 128], strides = [1, 1]} : vector<16x128xf32> to vector<15x128xf32>
    %14 = tpu.concatenate %12, %13 in 0 : vector<1x128xf32>, vector<15x128xf32> -> vector<16x128xf32>
    %c0_4 = arith.constant 0 : index
    %c0_5 = arith.constant 0 : index
    %c0_6 = arith.constant 0 : index
    %15 = vector.load %arg2[%c0_4, %c0_5, %c0_6] : memref<3x128x256xf32, #tpu.memory_space<vmem>>, vector<1x128x256xf32>
    %16 = vector.shape_cast %15 : vector<1x128x256xf32> to vector<128x256xf32>
    %cst_7 = arith.constant dense<0.000000e+00> : vector<16x256xf32>
    %17 = tpu.matmul %14, %16, %cst_7 {dimension_numbers = #tpu.dot_dimension_numbers<[1], [0], [0], [1], [0, 0, 1, 1], [], []>} : vector<16x128xf32>, vector<128x256xf32>, vector<16x256xf32> -> vector<16x256xf32>
    %c1 = arith.constant 1 : index
    %c0_8 = arith.constant 0 : index
    %c0_9 = arith.constant 0 : index
    %18 = vector.load %arg2[%c1, %c0_8, %c0_9] : memref<3x128x256xf32, #tpu.memory_space<vmem>>, vector<1x128x256xf32>
    %19 = vector.shape_cast %18 : vector<1x128x256xf32> to vector<128x256xf32>
    %cst_10 = arith.constant dense<0.000000e+00> : vector<16x256xf32>
    %20 = tpu.matmul %11, %19, %cst_10 {dimension_numbers = #tpu.dot_dimension_numbers<[1], [0], [0], [1], [0, 0, 1, 1], [], []>} : vector<16x128xf32>, vector<128x256xf32>, vector<16x256xf32> -> vector<16x256xf32>
    %21 = arith.addf %17, %20 : vector<16x256xf32>
    %cst_11 = arith.constant 0.000000e+00 : f32
    %22 = vector.broadcast %cst_11 : f32 to vector<1x128xf32>
    %23 = vector.extract_strided_slice %11 {offsets = [1, 0], sizes = [15, 128], strides = [1, 1]} : vector<16x128xf32> to vector<15x128xf32>
    %24 = tpu.concatenate %23, %22 in 0 : vector<15x128xf32>, vector<1x128xf32> -> vector<16x128xf32>
    %c2 = arith.constant 2 : index
    %c0_12 = arith.constant 0 : index
    %c0_13 = arith.constant 0 : index
    %25 = vector.load %arg2[%c2, %c0_12, %c0_13] : memref<3x128x256xf32, #tpu.memory_space<vmem>>, vector<1x128x256xf32>
    %26 = vector.shape_cast %25 : vector<1x128x256xf32> to vector<128x256xf32>
    %cst_14 = arith.constant dense<0.000000e+00> : vector<16x256xf32>
    %27 = tpu.matmul %24, %26, %cst_14 {dimension_numbers = #tpu.dot_dimension_numbers<[1], [0], [0], [1], [0, 0, 1, 1], [], []>} : vector<16x128xf32>, vector<128x256xf32>, vector<16x256xf32> -> vector<16x256xf32>
    %28 = arith.addf %21, %27 : vector<16x256xf32>
    %29 = vector.broadcast %1 : vector<1x256xf32> to vector<16x256xf32>
    %30 = arith.addf %28, %29 : vector<16x256xf32>
    %31 = vector.shape_cast %30 : vector<16x256xf32> to vector<1x16x256xf32>
    %cst_15 = arith.constant dense<0.000000e+00> : vector<1x256xf32>
    %32 = vector.multi_reduction <add>, %31, %cst_15 [1] : vector<1x16x256xf32> to vector<1x256xf32>
    %33 = arith.mulf %31, %31 : vector<1x16x256xf32>
    %cst_16 = arith.constant dense<0.000000e+00> : vector<1x256xf32>
    %34 = vector.multi_reduction <add>, %33, %cst_16 [1] : vector<1x16x256xf32> to vector<1x256xf32>
    %35 = tpu.concatenate %32, %34 in 0 : vector<1x256xf32>, vector<1x256xf32> -> vector<2x256xf32>
    %c0_17 = arith.constant 0 : index
    %c0_18 = arith.constant 0 : index
    %36 = vector.load %arg6[%c0_17, %c0_18] : memref<256x2xf32, #tpu.memory_space<vmem>>, vector<256x2xf32>
    %cst_19 = arith.constant dense<0.000000e+00> : vector<2x2xf32>
    %37 = tpu.matmul %35, %36, %cst_19 {dimension_numbers = #tpu.dot_dimension_numbers<[1], [0], [0], [1], [0, 0, 1, 1], [], []>} : vector<2x256xf32>, vector<256x2xf32>, vector<2x2xf32> -> vector<2x2xf32>
    %38 = vector.extract_strided_slice %37 {offsets = [0, 0], sizes = [1, 2], strides = [1, 1]} : vector<2x2xf32> to vector<1x2xf32>
    %cst_20 = arith.constant 4.8828125E-4 : f32
    %39 = vector.broadcast %cst_20 : f32 to vector<1x2xf32>
    %40 = arith.mulf %38, %39 : vector<1x2xf32>
    %41 = vector.extract_strided_slice %37 {offsets = [1, 0], sizes = [1, 2], strides = [1, 1]} : vector<2x2xf32> to vector<1x2xf32>
    %cst_21 = arith.constant 4.8828125E-4 : f32
    %42 = vector.broadcast %cst_21 : f32 to vector<1x2xf32>
    %43 = arith.mulf %41, %42 : vector<1x2xf32>
    %44 = arith.mulf %40, %40 : vector<1x2xf32>
    %45 = arith.subf %43, %44 : vector<1x2xf32>
    %cst_22 = arith.constant 0.000000e+00 : f32
    %46 = vector.broadcast %cst_22 : f32 to vector<1x2xf32>
    %47 = arith.maximumf %45, %46 : vector<1x2xf32>
    %cst_23 = arith.constant 9.99999974E-6 : f32
    %48 = vector.broadcast %cst_23 : f32 to vector<1x2xf32>
    %49 = arith.addf %47, %48 : vector<1x2xf32>
    %50 = math.rsqrt %49 : vector<1x2xf32>
    %51 = tpu.concatenate %40, %50 in 0 : vector<1x2xf32>, vector<1x2xf32> -> vector<2x2xf32>
    %c0_24 = arith.constant 0 : index
    %c0_25 = arith.constant 0 : index
    %52 = vector.load %arg7[%c0_24, %c0_25] : memref<2x256xf32, #tpu.memory_space<vmem>>, vector<2x256xf32>
    %cst_26 = arith.constant dense<0.000000e+00> : vector<2x256xf32>
    %53 = tpu.matmul %51, %52, %cst_26 {dimension_numbers = #tpu.dot_dimension_numbers<[1], [0], [0], [1], [0, 0, 1, 1], [], []>} : vector<2x2xf32>, vector<2x256xf32>, vector<2x256xf32> -> vector<2x256xf32>
    %54 = vector.extract_strided_slice %53 {offsets = [0, 0], sizes = [1, 256], strides = [1, 1]} : vector<2x256xf32> to vector<1x256xf32>
    %55 = vector.shape_cast %54 : vector<1x256xf32> to vector<1x1x256xf32>
    %56 = vector.extract_strided_slice %53 {offsets = [1, 0], sizes = [1, 256], strides = [1, 1]} : vector<2x256xf32> to vector<1x256xf32>
    %57 = vector.shape_cast %56 : vector<1x256xf32> to vector<1x1x256xf32>
    %58 = vector.broadcast %55 : vector<1x1x256xf32> to vector<1x16x256xf32>
    %59 = arith.subf %31, %58 : vector<1x16x256xf32>
    %60 = vector.broadcast %57 : vector<1x1x256xf32> to vector<1x16x256xf32>
    %61 = arith.mulf %59, %60 : vector<1x16x256xf32>
    %62 = vector.shape_cast %2 : vector<1x256xf32> to vector<1x1x256xf32>
    %63 = vector.broadcast %62 : vector<1x1x256xf32> to vector<1x16x256xf32>
    %64 = arith.mulf %61, %63 : vector<1x16x256xf32>
    %65 = vector.shape_cast %3 : vector<1x256xf32> to vector<1x1x256xf32>
    %66 = vector.broadcast %65 : vector<1x1x256xf32> to vector<1x16x256xf32>
    %67 = arith.addf %64, %66 : vector<1x16x256xf32>
    %68 = vector.shape_cast %67 : vector<1x16x256xf32> to vector<16x256xf32>
    %cst_27 = arith.constant 0.000000e+00 : f32
    %69 = vector.broadcast %cst_27 : f32 to vector<16x256xf32>
    %70 = arith.maximumf %68, %69 : vector<16x256xf32>
    %cst_28 = arith.constant 0.000000e+00 : f32
    %71 = vector.broadcast %cst_28 : f32 to vector<1x256xf32>
    %72 = vector.extract_strided_slice %70 {offsets = [0, 0], sizes = [15, 256], strides = [1, 1]} : vector<16x256xf32> to vector<15x256xf32>
    %73 = tpu.concatenate %71, %72 in 0 : vector<1x256xf32>, vector<15x256xf32> -> vector<16x256xf32>
    %c0_29 = arith.constant 0 : index
    %c0_30 = arith.constant 0 : index
    %c0_31 = arith.constant 0 : index
    %74 = vector.load %arg3[%c0_29, %c0_30, %c0_31] : memref<3x256x256xf32, #tpu.memory_space<vmem>>, vector<1x256x256xf32>
    %75 = vector.shape_cast %74 : vector<1x256x256xf32> to vector<256x256xf32>
    %cst_32 = arith.constant dense<0.000000e+00> : vector<16x256xf32>
    %76 = tpu.matmul %73, %75, %cst_32 {dimension_numbers = #tpu.dot_dimension_numbers<[1], [0], [0], [1], [0, 0, 1, 1], [], []>} : vector<16x256xf32>, vector<256x256xf32>, vector<16x256xf32> -> vector<16x256xf32>
    %c1_33 = arith.constant 1 : index
    %c0_34 = arith.constant 0 : index
    %c0_35 = arith.constant 0 : index
    %77 = vector.load %arg3[%c1_33, %c0_34, %c0_35] : memref<3x256x256xf32, #tpu.memory_space<vmem>>, vector<1x256x256xf32>
    %78 = vector.shape_cast %77 : vector<1x256x256xf32> to vector<256x256xf32>
    %cst_36 = arith.constant dense<0.000000e+00> : vector<16x256xf32>
    %79 = tpu.matmul %70, %78, %cst_36 {dimension_numbers = #tpu.dot_dimension_numbers<[1], [0], [0], [1], [0, 0, 1, 1], [], []>} : vector<16x256xf32>, vector<256x256xf32>, vector<16x256xf32> -> vector<16x256xf32>
    %80 = arith.addf %76, %79 : vector<16x256xf32>
    %cst_37 = arith.constant 0.000000e+00 : f32
    %81 = vector.broadcast %cst_37 : f32 to vector<1x256xf32>
    %82 = vector.extract_strided_slice %70 {offsets = [1, 0], sizes = [15, 256], strides = [1, 1]} : vector<16x256xf32> to vector<15x256xf32>
    %83 = tpu.concatenate %82, %81 in 0 : vector<15x256xf32>, vector<1x256xf32> -> vector<16x256xf32>
    %c2_38 = arith.constant 2 : index
    %c0_39 = arith.constant 0 : index
    %c0_40 = arith.constant 0 : index
    %84 = vector.load %arg3[%c2_38, %c0_39, %c0_40] : memref<3x256x256xf32, #tpu.memory_space<vmem>>, vector<1x256x256xf32>
    %85 = vector.shape_cast %84 : vector<1x256x256xf32> to vector<256x256xf32>
    %cst_41 = arith.constant dense<0.000000e+00> : vector<16x256xf32>
    %86 = tpu.matmul %83, %85, %cst_41 {dimension_numbers = #tpu.dot_dimension_numbers<[1], [0], [0], [1], [0, 0, 1, 1], [], []>} : vector<16x256xf32>, vector<256x256xf32>, vector<16x256xf32> -> vector<16x256xf32>
    %87 = arith.addf %80, %86 : vector<16x256xf32>
    %88 = vector.broadcast %4 : vector<1x256xf32> to vector<16x256xf32>
    %89 = arith.addf %87, %88 : vector<16x256xf32>
    %90 = vector.shape_cast %89 : vector<16x256xf32> to vector<1x16x256xf32>
    %cst_42 = arith.constant dense<0.000000e+00> : vector<1x256xf32>
    %91 = vector.multi_reduction <add>, %90, %cst_42 [1] : vector<1x16x256xf32> to vector<1x256xf32>
    %92 = arith.mulf %90, %90 : vector<1x16x256xf32>
    %cst_43 = arith.constant dense<0.000000e+00> : vector<1x256xf32>
    %93 = vector.multi_reduction <add>, %92, %cst_43 [1] : vector<1x16x256xf32> to vector<1x256xf32>
    %94 = tpu.concatenate %91, %93 in 0 : vector<1x256xf32>, vector<1x256xf32> -> vector<2x256xf32>
    %c0_44 = arith.constant 0 : index
    %c0_45 = arith.constant 0 : index
    %95 = vector.load %arg6[%c0_44, %c0_45] : memref<256x2xf32, #tpu.memory_space<vmem>>, vector<256x2xf32>
    %cst_46 = arith.constant dense<0.000000e+00> : vector<2x2xf32>
    %96 = tpu.matmul %94, %95, %cst_46 {dimension_numbers = #tpu.dot_dimension_numbers<[1], [0], [0], [1], [0, 0, 1, 1], [], []>} : vector<2x256xf32>, vector<256x2xf32>, vector<2x2xf32> -> vector<2x2xf32>
    %97 = vector.extract_strided_slice %96 {offsets = [0, 0], sizes = [1, 2], strides = [1, 1]} : vector<2x2xf32> to vector<1x2xf32>
    %cst_47 = arith.constant 4.8828125E-4 : f32
    %98 = vector.broadcast %cst_47 : f32 to vector<1x2xf32>
    %99 = arith.mulf %97, %98 : vector<1x2xf32>
    %100 = vector.extract_strided_slice %96 {offsets = [1, 0], sizes = [1, 2], strides = [1, 1]} : vector<2x2xf32> to vector<1x2xf32>
    %cst_48 = arith.constant 4.8828125E-4 : f32
    %101 = vector.broadcast %cst_48 : f32 to vector<1x2xf32>
    %102 = arith.mulf %100, %101 : vector<1x2xf32>
    %103 = arith.mulf %99, %99 : vector<1x2xf32>
    %104 = arith.subf %102, %103 : vector<1x2xf32>
    %cst_49 = arith.constant 0.000000e+00 : f32
    %105 = vector.broadcast %cst_49 : f32 to vector<1x2xf32>
    %106 = arith.maximumf %104, %105 : vector<1x2xf32>
    %cst_50 = arith.constant 9.99999974E-6 : f32
    %107 = vector.broadcast %cst_50 : f32 to vector<1x2xf32>
    %108 = arith.addf %106, %107 : vector<1x2xf32>
    %109 = math.rsqrt %108 : vector<1x2xf32>
    %110 = tpu.concatenate %99, %109 in 0 : vector<1x2xf32>, vector<1x2xf32> -> vector<2x2xf32>
    %c0_51 = arith.constant 0 : index
    %c0_52 = arith.constant 0 : index
    %111 = vector.load %arg7[%c0_51, %c0_52] : memref<2x256xf32, #tpu.memory_space<vmem>>, vector<2x256xf32>
    %cst_53 = arith.constant dense<0.000000e+00> : vector<2x256xf32>
    %112 = tpu.matmul %110, %111, %cst_53 {dimension_numbers = #tpu.dot_dimension_numbers<[1], [0], [0], [1], [0, 0, 1, 1], [], []>} : vector<2x2xf32>, vector<2x256xf32>, vector<2x256xf32> -> vector<2x256xf32>
    %113 = vector.extract_strided_slice %112 {offsets = [0, 0], sizes = [1, 256], strides = [1, 1]} : vector<2x256xf32> to vector<1x256xf32>
    %114 = vector.shape_cast %113 : vector<1x256xf32> to vector<1x1x256xf32>
    %115 = vector.extract_strided_slice %112 {offsets = [1, 0], sizes = [1, 256], strides = [1, 1]} : vector<2x256xf32> to vector<1x256xf32>
    %116 = vector.shape_cast %115 : vector<1x256xf32> to vector<1x1x256xf32>
    %117 = vector.broadcast %114 : vector<1x1x256xf32> to vector<1x16x256xf32>
    %118 = arith.subf %90, %117 : vector<1x16x256xf32>
    %119 = vector.broadcast %116 : vector<1x1x256xf32> to vector<1x16x256xf32>
    %120 = arith.mulf %118, %119 : vector<1x16x256xf32>
    %121 = vector.shape_cast %5 : vector<1x256xf32> to vector<1x1x256xf32>
    %122 = vector.broadcast %121 : vector<1x1x256xf32> to vector<1x16x256xf32>
    %123 = arith.mulf %120, %122 : vector<1x16x256xf32>
    %124 = vector.shape_cast %6 : vector<1x256xf32> to vector<1x1x256xf32>
    %125 = vector.broadcast %124 : vector<1x1x256xf32> to vector<1x16x256xf32>
    %126 = arith.addf %123, %125 : vector<1x16x256xf32>
    %127 = vector.shape_cast %126 : vector<1x16x256xf32> to vector<16x256xf32>
    %cst_54 = arith.constant 0.000000e+00 : f32
    %128 = vector.broadcast %cst_54 : f32 to vector<16x256xf32>
    %129 = arith.maximumf %127, %128 : vector<16x256xf32>
    %c0_55 = arith.constant 0 : index
    %c0_56 = arith.constant 0 : index
    %130 = vector.load %arg4[%c0_55, %c0_56] : memref<128x256xf32, #tpu.memory_space<vmem>>, vector<128x256xf32>
    %cst_57 = arith.constant dense<0.000000e+00> : vector<16x256xf32>
    %131 = tpu.matmul %11, %130, %cst_57 {dimension_numbers = #tpu.dot_dimension_numbers<[1], [0], [0], [1], [0, 0, 1, 1], [], []>} : vector<16x128xf32>, vector<128x256xf32>, vector<16x256xf32> -> vector<16x256xf32>
    %132 = vector.broadcast %7 : vector<1x256xf32> to vector<16x256xf32>
    %133 = arith.addf %131, %132 : vector<16x256xf32>
    %134 = vector.shape_cast %133 : vector<16x256xf32> to vector<1x16x256xf32>
    %cst_58 = arith.constant dense<0.000000e+00> : vector<1x256xf32>
    %135 = vector.multi_reduction <add>, %134, %cst_58 [1] : vector<1x16x256xf32> to vector<1x256xf32>
    %136 = arith.mulf %134, %134 : vector<1x16x256xf32>
    %cst_59 = arith.constant dense<0.000000e+00> : vector<1x256xf32>
    %137 = vector.multi_reduction <add>, %136, %cst_59 [1] : vector<1x16x256xf32> to vector<1x256xf32>
    %138 = tpu.concatenate %135, %137 in 0 : vector<1x256xf32>, vector<1x256xf32> -> vector<2x256xf32>
    %c0_60 = arith.constant 0 : index
    %c0_61 = arith.constant 0 : index
    %139 = vector.load %arg6[%c0_60, %c0_61] : memref<256x2xf32, #tpu.memory_space<vmem>>, vector<256x2xf32>
    %cst_62 = arith.constant dense<0.000000e+00> : vector<2x2xf32>
    %140 = tpu.matmul %138, %139, %cst_62 {dimension_numbers = #tpu.dot_dimension_numbers<[1], [0], [0], [1], [0, 0, 1, 1], [], []>} : vector<2x256xf32>, vector<256x2xf32>, vector<2x2xf32> -> vector<2x2xf32>
    %141 = vector.extract_strided_slice %140 {offsets = [0, 0], sizes = [1, 2], strides = [1, 1]} : vector<2x2xf32> to vector<1x2xf32>
    %cst_63 = arith.constant 4.8828125E-4 : f32
    %142 = vector.broadcast %cst_63 : f32 to vector<1x2xf32>
    %143 = arith.mulf %141, %142 : vector<1x2xf32>
    %144 = vector.extract_strided_slice %140 {offsets = [1, 0], sizes = [1, 2], strides = [1, 1]} : vector<2x2xf32> to vector<1x2xf32>
    %cst_64 = arith.constant 4.8828125E-4 : f32
    %145 = vector.broadcast %cst_64 : f32 to vector<1x2xf32>
    %146 = arith.mulf %144, %145 : vector<1x2xf32>
    %147 = arith.mulf %143, %143 : vector<1x2xf32>
    %148 = arith.subf %146, %147 : vector<1x2xf32>
    %cst_65 = arith.constant 0.000000e+00 : f32
    %149 = vector.broadcast %cst_65 : f32 to vector<1x2xf32>
    %150 = arith.maximumf %148, %149 : vector<1x2xf32>
    %cst_66 = arith.constant 9.99999974E-6 : f32
    %151 = vector.broadcast %cst_66 : f32 to vector<1x2xf32>
    %152 = arith.addf %150, %151 : vector<1x2xf32>
    %153 = math.rsqrt %152 : vector<1x2xf32>
    %154 = tpu.concatenate %143, %153 in 0 : vector<1x2xf32>, vector<1x2xf32> -> vector<2x2xf32>
    %c0_67 = arith.constant 0 : index
    %c0_68 = arith.constant 0 : index
    %155 = vector.load %arg7[%c0_67, %c0_68] : memref<2x256xf32, #tpu.memory_space<vmem>>, vector<2x256xf32>
    %cst_69 = arith.constant dense<0.000000e+00> : vector<2x256xf32>
    %156 = tpu.matmul %154, %155, %cst_69 {dimension_numbers = #tpu.dot_dimension_numbers<[1], [0], [0], [1], [0, 0, 1, 1], [], []>} : vector<2x2xf32>, vector<2x256xf32>, vector<2x256xf32> -> vector<2x256xf32>
    %157 = vector.extract_strided_slice %156 {offsets = [0, 0], sizes = [1, 256], strides = [1, 1]} : vector<2x256xf32> to vector<1x256xf32>
    %158 = vector.shape_cast %157 : vector<1x256xf32> to vector<1x1x256xf32>
    %159 = vector.extract_strided_slice %156 {offsets = [1, 0], sizes = [1, 256], strides = [1, 1]} : vector<2x256xf32> to vector<1x256xf32>
    %160 = vector.shape_cast %159 : vector<1x256xf32> to vector<1x1x256xf32>
    %161 = vector.broadcast %158 : vector<1x1x256xf32> to vector<1x16x256xf32>
    %162 = arith.subf %134, %161 : vector<1x16x256xf32>
    %163 = vector.broadcast %160 : vector<1x1x256xf32> to vector<1x16x256xf32>
    %164 = arith.mulf %162, %163 : vector<1x16x256xf32>
    %165 = vector.shape_cast %8 : vector<1x256xf32> to vector<1x1x256xf32>
    %166 = vector.broadcast %165 : vector<1x1x256xf32> to vector<1x16x256xf32>
    %167 = arith.mulf %164, %166 : vector<1x16x256xf32>
    %168 = vector.shape_cast %9 : vector<1x256xf32> to vector<1x1x256xf32>
    %169 = vector.broadcast %168 : vector<1x1x256xf32> to vector<1x16x256xf32>
    %170 = arith.addf %167, %169 : vector<1x16x256xf32>
    %171 = vector.shape_cast %170 : vector<1x16x256xf32> to vector<16x256xf32>
    %172 = arith.addf %171, %129 : vector<16x256xf32>
    %cst_70 = arith.constant 0.000000e+00 : f32
    %173 = vector.broadcast %cst_70 : f32 to vector<16x256xf32>
    %174 = arith.maximumf %172, %173 : vector<16x256xf32>
    %175 = vector.shape_cast %174 : vector<16x256xf32> to vector<1x16x256xf32>
    %c0_71 = arith.constant 0 : index
    %c0_72 = arith.constant 0 : index
    %c0_73 = arith.constant 0 : index
    %176 = vector.load %arg8[%c0_71, %c0_72, %c0_73] : memref<1x16x256xf32, #tpu.memory_space<vmem>>, vector<1x16x256xf32>
    tpu.vector_store %arg8[%c0_71, %c0_72, %c0_73], %175 {strides = array<i32>} : memref<1x16x256xf32, #tpu.memory_space<vmem>>, vector<1x16x256xf32>,
    return
  }
  func.func @transform_0(%arg0: i32) -> (i32, i32, i32) {
    %c0_i32 = arith.constant 0 : i32
    %c0_i32_0 = arith.constant 0 : i32
    %c0_i32_1 = arith.constant 0 : i32
    return %arg0, %c0_i32, %c0_i32_0 : i32, i32, i32
  }
  func.func @transform_1(%arg0: i32) -> (i32, i32, i32) {
    %c0_i32 = arith.constant 0 : i32
    %c0_i32_0 = arith.constant 0 : i32
    %c0_i32_1 = arith.constant 0 : i32
    %c0_i32_2 = arith.constant 0 : i32
    return %c0_i32, %c0_i32_0, %c0_i32_1 : i32, i32, i32
  }
  func.func @transform_2(%arg0: i32) -> (i32, i32, i32) {
    %c0_i32 = arith.constant 0 : i32
    %c0_i32_0 = arith.constant 0 : i32
    %c0_i32_1 = arith.constant 0 : i32
    %c0_i32_2 = arith.constant 0 : i32
    return %c0_i32, %c0_i32_0, %c0_i32_1 : i32, i32, i32
  }
  func.func @transform_3(%arg0: i32) -> (i32, i32) {
    %c0_i32 = arith.constant 0 : i32
    %c0_i32_0 = arith.constant 0 : i32
    %c0_i32_1 = arith.constant 0 : i32
    return %c0_i32, %c0_i32_0 : i32, i32
  }
  func.func @transform_4(%arg0: i32) -> (i32, i32) {
    %c0_i32 = arith.constant 0 : i32
    %c0_i32_0 = arith.constant 0 : i32
    %c0_i32_1 = arith.constant 0 : i32
    return %c0_i32, %c0_i32_0 : i32, i32
  }
  func.func @transform_5(%arg0: i32) -> (i32, i32) {
    %c0_i32 = arith.constant 0 : i32
    %c0_i32_0 = arith.constant 0 : i32
    %c0_i32_1 = arith.constant 0 : i32
    return %c0_i32, %c0_i32_0 : i32, i32
  }
  func.func @transform_6(%arg0: i32) -> (i32, i32) {
    %c0_i32 = arith.constant 0 : i32
    %c0_i32_0 = arith.constant 0 : i32
    %c0_i32_1 = arith.constant 0 : i32
    return %c0_i32, %c0_i32_0 : i32, i32
  }
  func.func @transform_7(%arg0: i32) -> (i32, i32, i32) {
    %c0_i32 = arith.constant 0 : i32
    %c0_i32_0 = arith.constant 0 : i32
    %c0_i32_1 = arith.constant 0 : i32
    return %arg0, %c0_i32, %c0_i32_0 : i32, i32, i32
  }
}

</mosaic_0001>

<bundles_post_ra>
// kernel: tpu_custom_call.1
= control target key start
LH: loop header
LB: loop body
LE: loop exit
PB: predicated region body
PF: predicated region fallthrough
CT: control target
= control target key end

     0   :  { %12 = vsyncpa [#allocation3], 0  ;;  %s3896_s0 = inlined_call_operand.hbm [shape: f32[2,16,128], index: 0, kind: input, shape index: {}]   ;;  %s3897_s1 = inlined_call_operand.hbm [shape: f32[3,128,256], index: 1, kind: input, shape index: {}]   ;;  %s3898_s2 = inlined_call_operand.hbm [shape: f32[3,256,256], index: 2, kind: input, shape index: {}]   ;;  %s3899_s3 = inlined_call_operand.vmem [shape: f32[128,256], index: 3, kind: input, shape index: {}]   ;;  %s3900_s4 = inlined_call_operand.hbm [shape: f32[9,256], index: 4, kind: input, shape index: {}]   ;;  %s3901_s5 = inlined_call_operand.vmem [shape: f32[256,2], index: 5, kind: input, shape index: {}]   ;;  %s3902_s6 = inlined_call_operand.vmem [shape: f32[2,256], index: 6, kind: input, shape index: {}]   ;;  %s3903_s7 = inlined_call_operand.hbm [shape: f32[2,16,256], index: 7, kind: output, shape index: {}]  }
   0x1   :  { %14 = vsyncpa [#allocation3 + $0x1], 0 }
   0x2   :  { %15 = vsyncpa [#allocation6], 0 }
   0x3   :  { %16 = vsyncpa [#allocation9], 0 }
   0x4   :  { %17 = vsyncpa [#allocation4], 0 }
   0x5   :  { %19 = vsyncpa [#allocation4 + $0x1], 0  ;;  %s3103_s24 = smov 0   ;;  %s3105_s25 = smov 0  }
   0x6   :  { %s3107_s26 = smov 0   ;;  %s3109_s27 = smov 0  }
   0x7 LB: > { %s3124_s28 = sadd.s32 4294967295, %s3049_s27   ;;  %s2186_s29 = sadd.s32 4294967294, %s3049_s27   ;;  %s3049_s27 = sphi %s3109_s27, %s3931_s27   ;;  %s3045_s26 = sphi %s3107_s26, %s3930_s26   ;;  %s3041_s25 = sphi %s3105_s25, %s3929_s25   ;;  %s3037_s24 = sphi %s3103_s24, %s3928_s24  }
   0x8   : > { %p45_p0 = scmp.ne.s32.totalorder %s3041_s25, %s3037_s24  ;;  %p3904_p1 = scmp.eq.s32.totalorder %s3124_s28, 0 }
   0x9   : > { %p201_p3 = scmp.eq.s32.totalorder %s2186_s29, 1  ;;  %p2187_p5 = scmp.ge.s32.totalorder %s3049_s27, 1 }
   0xa   : > { %p3133_p4 = por %p3904_p1, %p45_p0  ;;  %p208_p7 = scmp.lt.s32.totalorder %s3049_s27, 3 }
   0xb   : > { %p3138_p6 = por %p201_p3, %p45_p0  ;;  %s3051_s10 = smov [#allocation5]  }
   0xc   : > { %s3908_s30 = scalar_select %p3133_p4, 1, 0 }
   0xd   : > { %s3909_s8 = scalar_select %p3138_p6, 1, 0 }
   0xe   : > { %p3143_p8 = pnand %p2187_p5, %p208_p7  ;;  %s220_s11 = sshll.u32 %s3051_s10, 4  ;;  %s3147_s11 = int_to_ptr.vmem [resolvable:$true] %s220_s11 }
   0xf   : > { %3910 = sst [smem:[#allocation15_spill]] %s3909_s8  ;;  %s3052_s13 = smov [#allocation7]  }
  0x10   : > { %s3911_s9 = scalar_select %p3143_p8, 1, 0 }
  0x11   : > { %p2782_p9 = pneg %p3143_p8  ;;  %s233_s14 = sshll.u32 %s3052_s13, 4  ;;  %s3158_s14 = int_to_ptr.vmem [resolvable:$true] %s233_s14 }
  0x12   : > { %s3053_s15 = smov [#allocation8]   ;;  %s2861_s19 = scalar_lea.hbm %s3897_s1, 12288 }
  0x13   : > { %p3154_p11 = pnand %p2782_p9, %p3904_p1  ;;  %s3160_s16 = sshll.u32 %s3053_s15, 4  ;;  %s250_s16 = int_to_ptr.vmem [resolvable:$true] %s3160_s16 }
  0x14   : > { %p2862_p12 = scmp.ne.s32.totalorder %s3897_s1, %s2861_s19  ;;  %p2868_p5 = scmp.lt.u32.totalorder %s2861_s19, %s3897_s1 }
  0x15   : > { %p3170_p13 = pneg %p3154_p11 }
  0x17   : > { %p2864_p0 = pnand %p3170_p13, %p2862_p12 }
  0x19   : > { %p2865_p3 = pneg %p2864_p0 }
  0x1b   : > { %p2870_p7 = pnand %p2868_p5, %p2865_p3 }
  0x1d   : > { %2873 = shalt.err (!%p2870_p7)
}
  0x1e   : > { %s2874_s10 = scalar_lea.vmem %s3147_s11, 12288  ;;  %p2882_p2 = scmp.lt.s32.totalorder %s3147_s11, %s3147_s11 }
  0x1f   : > { %p2875_p9 = scmp.ne.s32.totalorder %s3147_s11, %s2874_s10  ;;  %p2883_p6 = scmp.lt.s32.totalorder %s2874_s10, %s2874_s10 }
  0x21   : > { %p2877_p10 = pnand %p2875_p9, %p3170_p13  ;;  %p2884_p12 = por %p2883_p6, %p2882_p2 }
  0x23   : > { %p2878_p1 = pneg %p2877_p10 }
  0x25   : > { %p2885_p0 = pnand %p2884_p12, %p2878_p1 }
  0x27   : > { %2888 = shalt.err (!%p2885_p0)
}
  0x28   : > { %s3054_s13 = smov 256   ;;  %s3055_s15 = smov 16  }
  0x29   : > { %2785 = dma.hbm_to_vmem [thread:$0]  (!%p3154_p11), %s3897_s1, 12288, %s3147_s11, [#allocation6], %s3054_s13, %s3054_s13, %s3055_s15  }
  0x2a   : > { %s2889_s21 = scalar_lea.hbm %s3898_s2, 24576 }
  0x2b   : > { %p2890_p1 = scmp.ne.s32.totalorder %s3898_s2, %s2889_s21  ;;  %p2896_p10 = scmp.lt.u32.totalorder %s2889_s21, %s3898_s2 }
  0x2d   : > { %p2892_p2 = pnand %p2890_p1, %p3170_p13 }
  0x2f   : > { %p2893_p6 = pneg %p2892_p2 }
  0x31   : > { %p2898_p3 = pnand %p2896_p10, %p2893_p6 }
  0x33   : > { %2901 = shalt.err (!%p2898_p3)
}
  0x34   : > { %s2902_s11 = scalar_lea.vmem %s3158_s14, 24576  ;;  %p2910_p12 = scmp.lt.s32.totalorder %s3158_s14, %s3158_s14 }
  0x35   : > { %p2903_p5 = scmp.ne.s32.totalorder %s3158_s14, %s2902_s11  ;;  %p2911_p0 = scmp.lt.s32.totalorder %s2902_s11, %s2902_s11 }
  0x37   : > { %p2905_p7 = pnand %p2903_p5, %p3170_p13  ;;  %p2912_p1 = por %p2911_p0, %p2910_p12 }
  0x39   : > { %p2906_p9 = pneg %p2905_p7 }
  0x3b   : > { %p2913_p2 = pnand %p2912_p1, %p2906_p9 }
  0x3d   : > { %2916 = shalt.err (!%p2913_p2)
}
  0x3e   : > { %2788 = dma.hbm_to_vmem [thread:$0]  (!%p3154_p11), %s3898_s2, 24576, %s3158_s14, [#allocation6], %s3054_s13, %s3054_s13, %s3055_s15  }
  0x3f   : > { %s2917_s20 = scalar_lea.hbm %s3900_s4, 512 }
  0x40   : > { %p2918_p6 = scmp.ne.s32.totalorder %s3900_s4, %s2917_s20  ;;  %p2924_p5 = scmp.lt.u32.totalorder %s2917_s20, %s3900_s4 }
  0x42   : > { %p2920_p10 = pnand %p2918_p6, %p3170_p13 }
  0x44   : > { %p2921_p3 = pneg %p2920_p10 }
  0x46   : > { %p2926_p7 = pnand %p2924_p5, %p2921_p3 }
  0x48   : > { %2929 = shalt.err (!%p2926_p7)
}
  0x49   : > { %s2930_s11 = scalar_lea.vmem %s250_s16, 512  ;;  %p2938_p1 = scmp.lt.s32.totalorder %s250_s16, %s250_s16 }
  0x4a   : > { %p2931_p9 = scmp.ne.s32.totalorder %s250_s16, %s2930_s11  ;;  %p2939_p2 = scmp.lt.s32.totalorder %s2930_s11, %s2930_s11 }
  0x4c   : > { %p2933_p12 = pnand %p2931_p9, %p3170_p13  ;;  %p2940_p4 = por %p2939_p2, %p2938_p1 }
  0x4e   : > { %p2934_p0 = pneg %p2933_p12 }
  0x50   : > { %p2941_p8 = pnand %p2940_p4, %p2934_p0 }
  0x52   : > { %2944 = shalt.err (!%p2941_p8)
}
  0x53   : > { %2791 = dma.hbm_to_vmem [thread:$0]  (!%p3154_p11), %s3900_s4, 512, %s250_s16, [#allocation9], %s3054_s13, %s3054_s13, %s3055_s15  }
  0x54   : > { %s3243_s22 = sadd.s32 1, %s3049_s27   ;;  %s32_s17 = sadd.s32 1, %s3045_s26 }
  0x55   : > { %s29_s12 = ssub.s32 %s3049_s27, %s3243_s22  ;;  %p39_p8 = scmp.ne.s32.totalorder %s3045_s26, %s3041_s25 }
  0x56   : > { %p30_p4 = scmp.eq.s32.totalorder %s29_s12, 0  ;;  %p40_p13 = scmp.eq.s32.totalorder %s3049_s27, 0 }
  0x57   : > { %p2803_p6 = scmp.lt.s32.totalorder %s3049_s27, 2  ;;  %p3914_p3 = scmp.eq.s32.totalorder %s3124_s28, 1 }
  0x58   : > { %s3253_s18 = scalar_select %p30_p4, %s3045_s26, %s32_s17  }
  0x59   : > { %p41_p10 = por %p40_p13, %p39_p8  ;;  %p3257_p5 = por %p3914_p3, %p39_p8 }
  0x5a   : > { %s269_s20 = sand.u32 1, %s3045_s26   ;;  %s2227_s21 = sshll.u32 %s3049_s27, 8 }
  0x5b   : > { %s2192_s16 = sshll.u32 %s269_s20, 4  ;;  %s3266_s23 = scalar_lea.hbm %s3896_s0, %s2227_s21 }
  0x5c   : > { %s273_s29 = scalar_lea.vmem [#allocation2], %s2192_s16  ;;  %p3268_p11 = pnand %p2803_p6, %p41_p10 }
  0x5d   : > { %s280_s10 = sshll.u32 %s273_s29, 4  ;;  %s3274_s14 = scalar_lea.sflag [#allocation3], %s269_s20  ;;  %s3272_s10 = int_to_ptr.vmem [resolvable:$true] %s280_s10 }
  0x5e   : > { %s2945_s8 = scalar_lea.hbm %s3266_s23, 256  ;;  %p2947_p9 = pneg %p3268_p11 }
  0x5f   : > { %p2946_p7 = scmp.ne.s32.totalorder %s3266_s23, %s2945_s8  ;;  %s2950_s21 = scalar_lea.hbm %s3896_s0, 512 }
  0x60   : > { %p2951_p1 = scmp.lt.u32.totalorder %s3266_s23, %s3896_s0  ;;  %p2952_p2 = scmp.lt.u32.totalorder %s2950_s21, %s2945_s8 }
  0x61   : > { %p2948_p12 = pnand %p2947_p9, %p2946_p7  ;;  %p2954_p8 = scmp.lt.u32.totalorder %s2945_s8, %s3266_s23 }
  0x62   : > { %p2953_p4 = por %p2952_p2, %p2951_p1 }
  0x63   : > { %p2949_p0 = pneg %p2948_p12 }
  0x64   : > { %p2955_p13 = por %p2954_p8, %p2953_p4 }
  0x66   : > { %p2956_p6 = pnand %p2955_p13, %p2949_p0 }
  0x68   : > { %2959 = shalt.err (!%p2956_p6)
}
  0x69   : > { %s2960_s20 = scalar_lea.vmem %s3272_s10, 256  ;;  %s3056_s15 = smov [#allocation2]  }
  0x6a   : > { %p2961_p10 = scmp.ne.s32.totalorder %s3272_s10, %s2960_s20  ;;  %s2965_s29 = sshll.u32 %s3056_s15, 4  ;;  %s2966_s29 = int_to_ptr.vmem [resolvable:$false] %s2965_s29 }
  0x6b   : > { %s2967_s12 = scalar_lea.vmem %s2966_s29, 512  ;;  %p2968_p12 = scmp.lt.s32.totalorder %s3272_s10, %s2966_s29 }
  0x6c   : > { %p2963_p3 = pnand %p2961_p10, %p2947_p9  ;;  %p2969_p1 = scmp.lt.s32.totalorder %s2967_s12, %s2960_s20 }
  0x6e   : > { %p2964_p7 = pneg %p2963_p3  ;;  %p2970_p2 = por %p2969_p1, %p2968_p12 }
  0x70   : > { %p2971_p4 = pnand %p2970_p2, %p2964_p7 }
  0x72   : > { %2974 = shalt.err (!%p2971_p4)
}
  0x73   : > { %s3057_s8 = smov 128   ;;  %s3058_s17 = smov 8  }
  0x74   : > { %2795 = dma.hbm_to_vmem [thread:$0]  (!%p3268_p11), %s3266_s23, 256, %s3272_s10, %s3274_s14, %s3057_s8, %s3057_s8, %s3058_s17  }
  0x75   : > { %p3917_p9 = scmp.ne.s32.totalorder %s3911_s9, 0 }
  0x76   : > { %s3305_s21 = sand.u32 (!%p3917_p9), 1, %s3041_s25   ;;  %p3918_p0 = scmp.ne.s32.totalorder (!%p3917_p9), %s3908_s30, 0 }
  0x77   : > { %292 = sbr.rel (%p3917_p9) target bundleno = 2289 (0x8f1), region = 48  ;;  %s2196_s16 = sshll.u32 (!%p3917_p9), %s3305_s21, 4 }
  0x78   : > { %s295_s13 = scalar_lea.sflag (!%p3917_p9), [#allocation3], %s3305_s21  ;;  %s3309_s20 = scalar_lea.vmem (!%p3917_p9), [#allocation2], %s2196_s16 }
  0x7e   : > { %3020 = dma.done.wait (%p3918_p0), %s295_s13, 256  }
  0x7f   : > { %3022 = vsyncadd (%p3918_p0), %s295_s13, 4294967040  ;;  %p3919_p11 = scmp.eq.s32.totalorder %s3124_s28, 0 }
  0x81   : > { %3024 = dma.done.wait (%p3919_p11), [#allocation6], 36864   ;;  %p3920_p8 = pmov %p3919_p11 }
  0x83   : > { %3026 = vsyncadd (%p3920_p8), [#allocation6], 4294930432  ;;  %p3921_p13 = pmov %p3920_p8 }
  0x84   : > { %p3922_p6 = pmov %p3920_p8 }
  0x85   : > { %3028 = dma.done.wait (%p3921_p13), [#allocation9], 512  }
  0x86   : > { %3030 = vsyncadd (%p3922_p6), [#allocation9], 4294966784  ;;  %v3059_v0 = vmov 0.0   ;;  %v390_v1 = vld [vmem:[#allocation5 + $0x108] sm:$0xff]  ;;  %v392_v2 = vld [vmem:[#allocation5 + $0x118] sm:$0xff]  ;;  %vm349_vm0 = vcmask 1040384  }
  0x87   : > { %485 = vmatprep.mubr.f32.mxu0 %v3059_v0  ;;  %v389_v3 = vld [vmem:[#allocation5 + $0x100] sm:$0xff]  ;;  %v2334_v4 = vpack.c.bf16 %v392_v2, %v390_v1  ;;  %v391_v5 = vld [vmem:[#allocation5 + $0x110] sm:$0xff]  ;;  %v394_v6 = vld [vmem:[#allocation5 + $0x128] sm:$0xff]  ;;  %vm575_vm2 = vcmask 1046528   ;;  %vm868_vm3 = vcmask 1041408   ;;  %vm864_vm4 = vcmask 15360  }
  0x88   : > { %v396_v7 = vld [vmem:[#allocation5 + $0x138] sm:$0xff]  ;;  %v2336_v8 = vpack.c.bf16 %v391_v5, %v389_v3  ;;  %v393_v10 = vld [vmem:[#allocation5 + $0x120] sm:$0xff]  ;;  %v395_v11 = vld [vmem:[#allocation5 + $0x130] sm:$0xff]  ;;  %s2228_s23 = sshll.u32 %s3124_s28, 9  ;;  %s2071_s28 = scalar_lea.sflag [#allocation4], %s3305_s21 }
  0x89   : > { %v2338_v9 = vpack.c.bf16 %v396_v7, %v394_v6  ;;  %v398_v12 = vld [vmem:[#allocation5 + $0x148] sm:$0xff]  ;;  %2335 = vmatprep.subr.bf16.mxu0 %v2334_v4  ;;  %v400_v13 = vld [vmem:[#allocation5 + $0x158] sm:$0xff]  ;;  %v2340_v14 = vpack.c.bf16 %v395_v11, %v393_v10  ;;  %v397_v16 = vld [vmem:[#allocation5 + $0x140] sm:$0xff]  ;;  %s3850_s29 = scalar_lea.hbm %s3903_s7, %s2228_s23  ;;  %s3060_s8 = smov [#allocation10]  }
  0x8a   : > { %2337 = vmatpush1.bf16.msra.mxu0 %v2336_v8  ;;  %v2342_v15 = vpack.c.bf16 %v400_v13, %v398_v12  ;;  %v399_v17 = vld [vmem:[#allocation5 + $0x150] sm:$0xff]  ;;  %v402_v18 = vld [vmem:[#allocation5 + $0x168] sm:$0xff]  ;;  %v404_v19 = vld [vmem:[#allocation5 + $0x178] sm:$0xff]  ;;  %s2979_s17 = sshll.u32 %s3060_s8, 4  ;;  %s2980_s17 = int_to_ptr.vmem [resolvable:$false] %s2979_s17 }
  0x8b   : > { %2339 = vmatprep.subr.bf16.mxu0 %v2338_v9  ;;  %v2344_v20 = vpack.c.bf16 %v399_v17, %v397_v16  ;;  %v2346_v21 = vpack.c.bf16 %v404_v19, %v402_v18  ;;  %v401_v22 = vld [vmem:[#allocation5 + $0x160] sm:$0xff]  ;;  %v403_v23 = vld [vmem:[#allocation5 + $0x170] sm:$0xff]  ;;  %v406_v24 = vld [vmem:[#allocation5 + $0x188] sm:$0xff]  ;;  %s2981_s16 = scalar_lea.vmem %s2980_s17, 1024 }
  0x8c   : > { %v408_v25 = vld [vmem:[#allocation5 + $0x198] sm:$0xff]  ;;  %v2348_v26 = vpack.c.bf16 %v403_v23, %v401_v22  ;;  %v405_v28 = vld [vmem:[#allocation5 + $0x180] sm:$0xff]  ;;  %v407_v29 = vld [vmem:[#allocation5 + $0x190] sm:$0xff] }
  0x8d   : > { %v2350_v27 = vpack.c.bf16 %v408_v25, %v406_v24  ;;  %v410_v30 = vld [vmem:[#allocation5 + $0x1a8] sm:$0xff]  ;;  %v412_v31 = vld [vmem:[#allocation5 + $0x1b8] sm:$0xff]  ;;  %v2352_v32 = vpack.c.bf16 %v407_v29, %v405_v28  ;;  %v409_v34 = vld [vmem:[#allocation5 + $0x1a0] sm:$0xff] }
  0x8e   : > { %2341 = vmatpush1.bf16.msra.mxu0 %v2340_v14  ;;  %v2354_v33 = vpack.c.bf16 %v412_v31, %v410_v30  ;;  %v411_v35 = vld [vmem:[#allocation5 + $0x1b0] sm:$0xff]  ;;  %v414_v36 = vld [vmem:[#allocation5 + $0x1c8] sm:$0xff]  ;;  %v416_v37 = vld [vmem:[#allocation5 + $0x1d8] sm:$0xff] }
  0x8f   : > { %2343 = vmatprep.subr.bf16.mxu0 %v2342_v15  ;;  %v2356_v38 = vpack.c.bf16 %v411_v35, %v409_v34  ;;  %v2358_v39 = vpack.c.bf16 %v416_v37, %v414_v36  ;;  %v413_v40 = vld [vmem:[#allocation5 + $0x1c0] sm:$0xff]  ;;  %v415_v41 = vld [vmem:[#allocation5 + $0x1d0] sm:$0xff]  ;;  %v418_v42 = vld [vmem:[#allocation5 + $0x1e8] sm:$0xff] }
  0x90   : > { %v420_v43 = vld [vmem:[#allocation5 + $0x1f8] sm:$0xff]  ;;  %v2360_v44 = vpack.c.bf16 %v415_v41, %v413_v40  ;;  %v417_v46 = vld [vmem:[#allocation5 + $0x1e0] sm:$0xff]  ;;  %v419_v47 = vld [vmem:[#allocation5 + $0x1f0] sm:$0xff] }
  0x91   : > { %v2362_v45 = vpack.c.bf16 %v420_v43, %v418_v42  ;;  %v357_v48 = vld [vmem:[#allocation5 + $0x8] sm:$0xff]  ;;  %v359_v49 = vld [vmem:[#allocation5 + $0x18] sm:$0xff]  ;;  %v2364_v50 = vpack.c.bf16 %v419_v47, %v417_v46  ;;  %v356_v52 = vld [vmem:[#allocation5] sm:$0xff] }
  0x92   : > { %2345 = vmatpush1.bf16.msra.mxu0 %v2344_v20  ;;  %v2366_v51 = vpack.c.bf16 %v359_v49, %v357_v48  ;;  %v358_v53 = vld [vmem:[#allocation5 + $0x10] sm:$0xff]  ;;  %v361_v54 = vld [vmem:[#allocation5 + $0x28] sm:$0xff]  ;;  %v363_v55 = vld [vmem:[#allocation5 + $0x38] sm:$0xff] }
  0x93   : > { %2347 = vmatprep.subr.bf16.mxu0 %v2346_v21  ;;  %v3325_v56 = vld [vmem:[%s3309_s20] sm:$0xff]  ;;  %v2368_v58 = vpack.c.bf16 %v358_v53, %v356_v52  ;;  %v365_v60 = vld [vmem:[#allocation5 + $0x48] sm:$0xff]  ;;  %v2370_v62 = vpack.c.bf16 %v363_v55, %v361_v54  ;;  %v367_v3 = vld [vmem:[#allocation5 + $0x58] sm:$0xff] }
  0x94   : > { %v360_v57 = vld [vmem:[#allocation5 + $0x20] sm:$0xff]  ;;  %v362_v59 = vld [vmem:[#allocation5 + $0x30] sm:$0xff]  ;;  %v759_v63 = vld [vmem:[%s3901_s5 + $0x88] sm:$0xff]  ;;  %v2374_v13 = vpack.c.bf16 %v367_v3, %v365_v60  ;;  %v350_v55 = vrot.slane %v3325_v56, 7 }
  0x95   : > { %v758_v61 = vld [vmem:[%s3901_s5 + $0x80] sm:$0xff]  ;;  %v743_v2 = vld [vmem:[%s3901_s5 + $0x8] sm:$0xff]  ;;  %v760_v6 = vld [vmem:[%s3901_s5 + $0x90] sm:$0xff]  ;;  %v2372_v11 = vpack.c.bf16 %v362_v59, %v360_v57 }
  0x96   : > { %2349 = vmatpush1.bf16.msra.mxu0 %v2348_v26  ;;  %v742_v1 = vld [vmem:[%s3901_s5] sm:$0xff]  ;;  %v3339_v4 = vpack.c.bf16 %v759_v63, %v758_v61  ;;  %v761_v7 = vld [vmem:[%s3901_s5 + $0x98] sm:$0xff]  ;;  %v744_v9 = vld [vmem:[%s3901_s5 + $0x10] sm:$0xff] }
  0x97   : > { %2351 = vmatprep.subr.bf16.mxu0 %v2350_v27  ;;  %v3341_v5 = vpack.c.bf16 %v743_v2, %v742_v1  ;;  %v3350_v8 = vpack.c.bf16 %v761_v7, %v760_v6  ;;  %v745_v10 = vld [vmem:[%s3901_s5 + $0x18] sm:$0xff]  ;;  %v364_v14 = vld [vmem:[#allocation5 + $0x40] sm:$0xff]  ;;  %v366_v15 = vld [vmem:[#allocation5 + $0x50] sm:$0xff] }
  0x98   : > { %v3360_v12 = vld [vmem:[%s3309_s20 + $0x8] sm:$0xff]  ;;  %2431 = vmatprep.subr.bf16.mxu1 %v3339_v4  ;;  %v3364_v18 = vpack.c.bf16 %v745_v10, %v744_v9  ;;  %v2376_v19 = vpack.c.bf16 %v366_v15, %v364_v14  ;;  %v368_v21 = vld [vmem:[#allocation5 + $0x60] sm:$0xff]  ;;  %v370_v22 = vld [vmem:[#allocation5 + $0x70] sm:$0xff] }
  0x99   : > { %v369_v16 = vld [vmem:[#allocation5 + $0x68] sm:$0xff]  ;;  %v371_v17 = vld [vmem:[#allocation5 + $0x78] sm:$0xff]  ;;  %2433 = vmatpush3.bf16.msra.mxu1 %v3341_v5  ;;  %v2380_v25 = vpack.c.bf16 %v370_v22, %v368_v21  ;;  %v372_v27 = vld [vmem:[#allocation5 + $0x80] sm:$0xff]  ;;  %v351_v59 = vrot.slane %v3360_v12, 7 }
  0x9a   : > { %2353 = vmatpush1.bf16.msra.mxu0 %v2352_v32  ;;  %2435 = vmatprep.subr.bf16.mxu1 %v3350_v8  ;;  %v2378_v20 = vpack.c.bf16 %v371_v17, %v369_v16  ;;  %v373_v23 = vld [vmem:[#allocation5 + $0x88] sm:$0xff]  ;;  %v375_v24 = vld [vmem:[#allocation5 + $0x98] sm:$0xff]  ;;  %v374_v28 = vld [vmem:[#allocation5 + $0x90] sm:$0xff] }
  0x9b   : > { %2355 = vmatprep.subr.bf16.mxu0 %v2354_v33  ;;  %v2382_v26 = vpack.c.bf16 %v375_v24, %v373_v23  ;;  %v377_v29 = vld [vmem:[#allocation5 + $0xa8] sm:$0xff]  ;;  %v379_v30 = vld [vmem:[#allocation5 + $0xb8] sm:$0xff]  ;;  %v2384_v31 = vpack.c.bf16 %v374_v28, %v372_v27  ;;  %v376_v33 = vld [vmem:[#allocation5 + $0xa0] sm:$0xff]  ;;  %v352_v3 = vsel %vm349_vm0, %v350_v55, %v351_v59 }
  0x9c   : > { %v2386_v32 = vpack.c.bf16 %v379_v30, %v377_v29  ;;  %v378_v34 = vld [vmem:[#allocation5 + $0xb0] sm:$0xff]  ;;  %v381_v35 = vld [vmem:[#allocation5 + $0xc8] sm:$0xff]  ;;  %v383_v36 = vld [vmem:[#allocation5 + $0xd8] sm:$0xff] }
  0x9d   : > { %2437 = vmatpush3.bf16.msra.mxu1 %v3364_v18  ;;  %v2388_v37 = vpack.c.bf16 %v378_v34, %v376_v33  ;;  %v382_v40 = vld [vmem:[#allocation5 + $0xd0] sm:$0xff]  ;;  %v385_v41 = vld [vmem:[#allocation5 + $0xe8] sm:$0xff]  ;;  %v387_v42 = vld [vmem:[#allocation5 + $0xf8] sm:$0xff] }
  0x9e   : > { %2357 = vmatpush1.bf16.msra.mxu0 %v2356_v38  ;;  %v2390_v38 = vpack.c.bf16 %v383_v36, %v381_v35  ;;  %v386_v46 = vld [vmem:[#allocation5 + $0xf0] sm:$0xff]  ;;  %v584_v47 = vld [vmem:[#allocation5 + $0x208] sm:$0xff]  ;;  %v586_v48 = vld [vmem:[#allocation5 + $0x218] sm:$0xff] }
  0x9f   : > { %2359 = vmatprep.subr.bf16.mxu0 %v2358_v39  ;;  %v380_v39 = vld [vmem:[#allocation5 + $0xc0] sm:$0xff]  ;;  %v585_v52 = vld [vmem:[#allocation5 + $0x210] sm:$0xff]  ;;  %v588_v53 = vld [vmem:[#allocation5 + $0x228] sm:$0xff] }
  0xa0   : > { %v2392_v43 = vpack.c.bf16 %v382_v40, %v380_v39  ;;  %v590_v54 = vld [vmem:[#allocation5 + $0x238] sm:$0xff]  ;;  %vm3372_vm1 = vmneg %vm349_vm0  ;;  %v587_v61 = vld [vmem:[#allocation5 + $0x220] sm:$0xff] }
  0xa1   : > { %v2402_v60 = vpack.c.bf16 %v590_v54, %v588_v53  ;;  %v592_v63 = vld [vmem:[#allocation5 + $0x248] sm:$0xff]  ;;  %v594_v1 = vld [vmem:[#allocation5 + $0x258] sm:$0xff]  ;;  %v591_v7 = vld [vmem:[#allocation5 + $0x240] sm:$0xff] }
  0xa2   : > { %2361 = vmatpush1.bf16.msra.mxu0 %v2360_v44  ;;  %v2394_v44 = vpack.c.bf16 %v387_v42, %v385_v41  ;;  %v2406_v6 = vpack.c.bf16 %v594_v1, %v592_v63  ;;  %v593_v9 = vld [vmem:[#allocation5 + $0x250] sm:$0xff]  ;;  %v596_v10 = vld [vmem:[#allocation5 + $0x268] sm:$0xff]  ;;  %v595_v15 = vld [vmem:[#allocation5 + $0x260] sm:$0xff]  ;;  %v576_v42 = vrot.slane %v3325_v56, 1 }
  0xa3   : > { %2363 = vmatprep.subr.bf16.mxu0 %v2362_v45  ;;  %v384_v45 = vld [vmem:[#allocation5 + $0xe0] sm:$0xff]  ;;  %v597_v16 = vld [vmem:[#allocation5 + $0x270] sm:$0xff]  ;;  %v600_v17 = vld [vmem:[#allocation5 + $0x288] sm:$0xff] }
  0xa4   : > { %v2396_v49 = vpack.c.bf16 %v386_v46, %v384_v45  ;;  %v599_v22 = vld [vmem:[#allocation5 + $0x280] sm:$0xff]  ;;  %v601_v23 = vld [vmem:[#allocation5 + $0x290] sm:$0xff]  ;;  %v604_v24 = vld [vmem:[#allocation5 + $0x2a8] sm:$0xff] }
  0xa5   : > { %v603_v28 = vld [vmem:[#allocation5 + $0x2a0] sm:$0xff]  ;;  %v605_v29 = vld [vmem:[#allocation5 + $0x2b0] sm:$0xff]  ;;  %v608_v30 = vld [vmem:[#allocation5 + $0x2c8] sm:$0xff] }
  0xa6   : > { %2365 = vmatpush1.bf16.msra.mxu0 %v2364_v50  ;;  %v2398_v50 = vpack.c.bf16 %v586_v48, %v584_v47  ;;  %v607_v34 = vld [vmem:[#allocation5 + $0x2c0] sm:$0xff]  ;;  %v609_v35 = vld [vmem:[#allocation5 + $0x2d0] sm:$0xff]  ;;  %v612_v36 = vld [vmem:[#allocation5 + $0x2e8] sm:$0xff] }
  0xa7   : > { %2367 = vmatprep.subr.bf16.mxu0 %v2366_v51  ;;  %v583_v51 = vld [vmem:[#allocation5 + $0x200] sm:$0xff]  ;;  %v613_v41 = vld [vmem:[#allocation5 + $0x2f0] sm:$0xff]  ;;  %v747_v48 = vld [vmem:[%s3901_s5 + $0x28] sm:$0xff] }
  0xa8   : > { %v611_v40 = vld [vmem:[#allocation5 + $0x2e0] sm:$0xff]  ;;  %v748_v53 = vld [vmem:[%s3901_s5 + $0x30] sm:$0xff]  ;;  %v749_v54 = vld [vmem:[%s3901_s5 + $0x38] sm:$0xff] }
  0xa9   : > { %486 = vmatmul.mubr.f32.vlgmr.msra.gmra.mrb[0].mxu0 %v3325_v56  ;;  %v762_v56 = vld [vmem:[%s3901_s5 + $0xa0] sm:$0xff]  ;;  %v767_v59 = vld [vmem:[%s3901_s5 + $0xc8] sm:$0xff]  ;;  %v768_v1 = vld [vmem:[%s3901_s5 + $0xd0] sm:$0xff] }
  0xaa   : > { %2369 = vmatpush1.bf16.msra.mxu0 %v2368_v58  ;;  %491 = vmatprep.mubr.f32.mxu0 %v3059_v0  ;;  %v2400_v58 = vpack.c.bf16 %v585_v52, %v583_v51  ;;  %v746_v47 = vld [vmem:[%s3901_s5 + $0x20] sm:$0xff]  ;;  %v765_v51 = vld [vmem:[%s3901_s5 + $0xb8] sm:$0xff] }
  0xab   : > { %2371 = vmatprep.subr.bf16.mxu0 %v2370_v62  ;;  %v589_v62 = vld [vmem:[#allocation5 + $0x230] sm:$0xff] }
  0xac   : > { %v2404_v2 = vpack.c.bf16 %v589_v62, %v587_v61  ;;  %v750_v61 = vld [vmem:[%s3901_s5 + $0x40] sm:$0xff]  ;;  %v751_v62 = vld [vmem:[%s3901_s5 + $0x48] sm:$0xff] }
  0xad   : > { %492 = vmatmul.mubr.f32.gmra.mrb[2].mxu0 %v3360_v12  ;;  %v3438_v63 = vpack.c.bf16 %v751_v62, %v750_v61 }
  0xae   : > { %2373 = vmatpush1.bf16.msra.mxu0 %v2372_v11  ;;  %562 = vmatprep.mubr.f32.mxu0 %v3059_v0  ;;  %v598_v11 = vld [vmem:[#allocation5 + $0x278] sm:$0xff] }
  0xaf   : > { %2375 = vmatprep.subr.bf16.mxu0 %v2374_v13  ;;  %v2408_v13 = vpack.c.bf16 %v593_v9, %v591_v7  ;;  %v2410_v14 = vpack.c.bf16 %v598_v11, %v596_v10  ;;  %v753_v7 = vld [vmem:[%s3901_s5 + $0x58] sm:$0xff]  ;;  %v770_v10 = vld [vmem:[%s3901_s5 + $0xe0] sm:$0xff]  ;;  %v771_v11 = vld [vmem:[%s3901_s5 + $0xe8] sm:$0xff] }
  0xb2   : > { %2377 = vmatpush1.bf16.msra.mxu0 %v2376_v19  ;;  %v602_v19 = vld [vmem:[#allocation5 + $0x298] sm:$0xff] }
  0xb3   : > { %2379 = vmatprep.subr.bf16.mxu0 %v2378_v20  ;;  %v2412_v20 = vpack.c.bf16 %v597_v16, %v595_v15  ;;  %v2414_v21 = vpack.c.bf16 %v602_v19, %v600_v17  ;;  %v755_v15 = vld [vmem:[%s3901_s5 + $0x68] sm:$0xff]  ;;  %v772_v16 = vld [vmem:[%s3901_s5 + $0xf0] sm:$0xff]  ;;  %v773_v17 = vld [vmem:[%s3901_s5 + $0xf8] sm:$0xff] }
  0xb6   : > { %2381 = vmatpush1.bf16.msra.mxu0 %v2380_v25  ;;  %v606_v25 = vld [vmem:[#allocation5 + $0x2b8] sm:$0xff] }
  0xb7   : > { %2383 = vmatprep.subr.bf16.mxu0 %v2382_v26  ;;  %v2416_v26 = vpack.c.bf16 %v601_v23, %v599_v22  ;;  %v2418_v27 = vpack.c.bf16 %v606_v25, %v604_v24  ;;  %v757_v22 = vld [vmem:[%s3901_s5 + $0x78] sm:$0xff]  ;;  %v696_v24 = vlaneseq }
  0xb9   : > { %v3496_v25 = vshrl.u32 %v696_v24, 7 }
  0xba   : > { %2385 = vmatpush1.bf16.msra.mxu0 %v2384_v31  ;;  %v610_v31 = vld [vmem:[#allocation5 + $0x2d8] sm:$0xff] }
  0xbb   : > { %2387 = vmatprep.subr.bf16.mxu0 %v2386_v32  ;;  %v2420_v32 = vpack.c.bf16 %v605_v29, %v603_v28  ;;  %v2422_v33 = vpack.c.bf16 %v610_v31, %v608_v30  ;;  %v3503_v28 = vld [vmem:[#allocation8 + $0x8] sm:$0xff] }
  0xbe   : > { %2389 = vmatpush1.bf16.msra.mxu0 %v2388_v37  ;;  %v614_v37 = vld [vmem:[#allocation5 + $0x2f8] sm:$0xff] }
  0xbf   : > { %2391 = vmatprep.subr.bf16.mxu0 %v2390_v38  ;;  %v2424_v38 = vpack.c.bf16 %v609_v35, %v607_v34  ;;  %v2426_v39 = vpack.c.bf16 %v614_v37, %v612_v36 }
  0xc2   : > { %2393 = vmatpush1.bf16.msra.mxu0 %v2392_v43  ;;  %v577_v43 = vrot.slane %v3360_v12, 1  ;;  %v763_v12 = vld [vmem:[%s3901_s5 + $0xa8] sm:$0xff] }
  0xc3   : > { %2395 = vmatprep.subr.bf16.mxu0 %v2394_v44  ;;  %v2428_v44 = vpack.c.bf16 %v613_v41, %v611_v40  ;;  %v3394_v46 = vpack.c.bf16 %v763_v12, %v762_v56 }
  0xc4   : > { %v578_v45 = vsel %vm575_vm2, %v576_v42, %v577_v43 }
  0xc5   : > { %2439 = vmatprep.subr.bf16.mxu1 %v3394_v46 }
  0xc6   : > { %2397 = vmatpush1.bf16.msra.mxu0 %v2396_v49  ;;  %v3402_v49 = vpack.c.bf16 %v747_v48, %v746_v47 }
  0xc7   : > { %2399 = vmatprep.subr.bf16.mxu0 %v2398_v50  ;;  %v764_v50 = vld [vmem:[%s3901_s5 + $0xb0] sm:$0xff] }
  0xc8   : > { %2441 = vmatpush3.bf16.msra.mxu1 %v3402_v49  ;;  %v3412_v52 = vpack.c.bf16 %v765_v51, %v764_v50 }
  0xc9   : > { %2202 = vmatmul.mubr.msk.f32.vlgmr.msra.gmra.mrb[0].mxu0 %vm3372_vm1, %v350_v55  ;;  %v3420_v55 = vpack.c.bf16 %v749_v54, %v748_v53 }
  0xca   : > { %2401 = vmatpush1.bf16.msra.mxu0 %v2400_v58  ;;  %568 = vmatprep.mubr.f32.mxu0 %v3059_v0  ;;  %v766_v58 = vld [vmem:[%s3901_s5 + $0xc0] sm:$0xff] }
  0xcb   : > { %2403 = vmatprep.subr.bf16.mxu0 %v2402_v60  ;;  %2443 = vmatprep.subr.bf16.mxu1 %v3412_v52  ;;  %v3430_v60 = vpack.c.bf16 %v767_v59, %v766_v58 }
  0xcc   : > { %2445 = vmatpush3.bf16.msra.mxu1 %v3420_v55 }
  0xcd   : > { %569 = vmatmul.mubr.f32.gmra.mrb[2].mxu0 %v352_v3  ;;  %2447 = vmatprep.subr.bf16.mxu1 %v3430_v60 }
  0xce   : > { %2405 = vmatpush1.bf16.msra.mxu0 %v2404_v2  ;;  %679 = vmatprep.mubr.f32.mxu0 %v3059_v0  ;;  %v769_v2 = vld [vmem:[%s3901_s5 + $0xd8] sm:$0xff] }
  0xcf   : > { %2407 = vmatprep.subr.bf16.mxu0 %v2406_v6  ;;  %v3448_v3 = vpack.c.bf16 %v769_v2, %v768_v1  ;;  %v752_v6 = vld [vmem:[%s3901_s5 + $0x50] sm:$0xff] }
  0xd0   : > { %2449 = vmatpush3.bf16.msra.mxu1 %v3438_v63  ;;  %v3456_v9 = vpack.c.bf16 %v753_v7, %v752_v6 }
  0xd1   : > { %2451 = vmatprep.subr.bf16.mxu1 %v3448_v3 }
  0xd2   : > { %2409 = vmatpush1.bf16.msra.mxu0 %v2408_v13  ;;  %v754_v13 = vld [vmem:[%s3901_s5 + $0x60] sm:$0xff] }
  0xd3   : > { %2411 = vmatprep.subr.bf16.mxu0 %v2410_v14  ;;  %v3468_v14 = vpack.c.bf16 %v771_v11, %v770_v10  ;;  %v3480_v19 = vpack.c.bf16 %v755_v15, %v754_v13 }
  0xd4   : > { %2453 = vmatpush3.bf16.msra.mxu1 %v3456_v9 }
  0xd5   : > { %2455 = vmatprep.subr.bf16.mxu1 %v3468_v14 }
  0xd6   : > { %2413 = vmatpush1.bf16.msra.mxu0 %v2412_v20  ;;  %v3483_v20 = vpack.c.bf16 %v773_v17, %v772_v16 }
  0xd7   : > { %2415 = vmatprep.subr.bf16.mxu0 %v2414_v21  ;;  %v756_v21 = vld [vmem:[%s3901_s5 + $0x70] sm:$0xff] }
  0xd8   : > { %2457 = vmatpush3.bf16.msra.mxu1 %v3480_v19  ;;  %v3492_v23 = vpack.c.bf16 %v757_v22, %v756_v21 }
  0xd9   : > { %2459 = vmatprep.subr.bf16.mxu1 %v3483_v20 }
  0xda   : > { %2417 = vmatpush1.bf16.msra.mxu0 %v2416_v26  ;;  %v3499_v26 = vsub.s32 0, %v3496_v25 }
  0xdb   : > { %2419 = vmatprep.subr.bf16.mxu0 %v2418_v27  ;;  %v3501_v27 = vld [vmem:[#allocation8] sm:$0xff] }
  0xdc   : > { %2461 = vmatpush3.bf16.msra.mxu1 %v3492_v23  ;;  %v699_v29 = vrot.slane %v3501_v27, %v3499_v26  ;;  %v703_v31 = vrot.slane %v3503_v28, %v3499_v26 }
  0xde   : > { %2421 = vmatpush1.bf16.msra.mxu0 %v2420_v32 }
  0xdf   : > { %2423 = vmatprep.subr.bf16.mxu0 %v2422_v33 }
  0xe2   : > { %2425 = vmatpush1.bf16.msra.mxu0 %v2424_v38 }
  0xe3   : > { %2427 = vmatprep.subr.bf16.mxu0 %v2426_v39 }
  0xe6   : > { %2429 = vmatpush1.bf16.msra.mxu0 %v2428_v44 }
  0xe9   : > { %680 = vmatmul.mubr.f32.vlgmr.msra.gmra.mrb[0].mxu0 %v578_v45 }
  0xea   : > { %685 = vmatprep.mubr.f32.mxu0 %v3059_v0 }
  0xed   : > { %2203 = vmatmul.mubr.msk.f32.gmra.mrb[2].mxu0 %vm575_vm2, %v577_v43 }
  0xee   : > { %937 = vmatprep.mubr.f32.mxu0 %v3059_v0 }
 0x1bc   : > { %v681_v30 = vpop.f32.mrb[0].mxu0 }
 0x1bd   : > { %v683_v32 = vpop.f32.mrb[1].mxu0  ;;  %v3509_v33 = vadd.f32 %v699_v29, %v681_v30 }
 0x1be   : > { %v3511_v34 = vadd.f32 %v703_v31, %v683_v32 }
 0x1bf   : > { %v722_v39 = vmul.f32 %v3509_v33, %v3509_v33 }
 0x1c0   : > { %v687_v35 = vpop.f32.mrb[2].mxu0  ;;  %v723_v42 = vmul.f32 %v3511_v34, %v3511_v34 }
 0x1c1   : > { %v3513_v36 = vadd.f32 %v699_v29, %v687_v35  ;;  %v689_v37 = vpop.f32.mrb[3].mxu0  ;;  %v1078_v35 = vld [vmem:[#allocation7 + $0x208] sm:$0xff] }
 0x1c2   : > { %v3515_v38 = vadd.f32 %v703_v31, %v689_v37  ;;  %v2204_v31 = vld.sshfl [vmem:[%s3902_s6] sm:$0x33 pattern:$0x76325410]  ;;  %v1080_v37 = vld [vmem:[#allocation7 + $0x218] sm:$0xff] }
 0x1c3   : > { %v708_v40 = vadd.f32 %v3513_v36, %v3509_v33  ;;  %v724_v41 = vmul.f32 %v3513_v36, %v3513_v36  ;;  %v3534_v32 = vcombine.high %v2204_v31, %v2204_v31 }
 0x1c4   : > { %v715_v43 = vadd.f32 %v3515_v38, %v3511_v34  ;;  %v725_v44 = vmul.f32 %v3515_v38, %v3515_v38 }
 0x1c5   : > { %v709_v45 = vrot.slane %v708_v40, 4  ;;  %v726_v56 = vadd.f32 %v724_v41, %v722_v39  ;;  %2205 = vmatprep.subr.msk.mxu0 %vm868_vm3, %v3534_v32  ;;  %v1077_v39 = vld [vmem:[#allocation7 + $0x200] sm:$0xff]  ;;  %v1079_v41 = vld [vmem:[#allocation7 + $0x210] sm:$0xff] }
 0x1c6   : > { %v716_v12 = vrot.slane %v715_v43, 4  ;;  %v733_v47 = vadd.f32 %v725_v44, %v723_v42  ;;  %2206 = vmatpush1.msk.msra.mxu0 %vm868_vm3, %v2204_v31  ;;  %v1082_v42 = vld [vmem:[#allocation7 + $0x228] sm:$0xff]  ;;  %v2464_v44 = vpack.c.bf16 %v1079_v41, %v1077_v39  ;;  %v1104_v31 = vld [vmem:[#allocation7 + $0x2d8] sm:$0xff]  ;;  %v1101_v39 = vld [vmem:[#allocation7 + $0x2c0] sm:$0xff] }
 0x1c7   : > { %v710_v48 = vadd.f32 %v709_v45, %v708_v40  ;;  %v727_v50 = vrot.slane %v726_v56, 4  ;;  %2655 = vmatprep.subr.bf16.mxu0 %v3339_v4  ;;  %v2462_v40 = vpack.c.bf16 %v1080_v37, %v1078_v35  ;;  %v1106_v41 = vld [vmem:[#allocation7 + $0x2e8] sm:$0xff] }
 0x1c8   : > { %v717_v51 = vadd.f32 %v716_v12, %v715_v43  ;;  %v734_v53 = vrot.slane %v733_v47, 4  ;;  %v1084_v43 = vld [vmem:[#allocation7 + $0x238] sm:$0xff]  ;;  %v1083_v12 = vld [vmem:[#allocation7 + $0x230] sm:$0xff] }
 0x1c9   : > { %v711_v54 = vrot.slane %v710_v48, 2  ;;  %v728_v58 = vadd.f32 %v727_v50, %v726_v56  ;;  %v2466_v45 = vpack.c.bf16 %v1084_v43, %v1082_v42  ;;  %v1081_v56 = vld [vmem:[#allocation7 + $0x220] sm:$0xff]  ;;  %2463 = vmatprep.subr.bf16.mxu1 %v2462_v40  ;;  %v1103_v40 = vld [vmem:[#allocation7 + $0x2d0] sm:$0xff]  ;;  %v1108_v42 = vld [vmem:[#allocation7 + $0x2f8] sm:$0xff] }
 0x1ca   : > { %v718_v59 = vrot.slane %v717_v51, 2  ;;  %v735_v61 = vadd.f32 %v734_v53, %v733_v47  ;;  %v1086_v47 = vld [vmem:[#allocation7 + $0x248] sm:$0xff]  ;;  %v2468_v50 = vpack.c.bf16 %v1083_v12, %v1081_v56  ;;  %v1085_v53 = vld [vmem:[#allocation7 + $0x240] sm:$0xff]  ;;  %v2488_v43 = vpack.c.bf16 %v1103_v40, %v1101_v39  ;;  %v1107_v56 = vld [vmem:[#allocation7 + $0x2f0] sm:$0xff] }
 0x1cb   : > { %v712_v62 = vadd.f32 %v711_v54, %v710_v48  ;;  %v729_v1 = vrot.slane %v728_v58, 2  ;;  %v1088_v48 = vld [vmem:[#allocation7 + $0x258] sm:$0xff]  ;;  %v1087_v54 = vld [vmem:[#allocation7 + $0x250] sm:$0xff]  ;;  %v1110_v12 = vld [vmem:[#allocation7 + $0x308] sm:$0xff] }
 0x1cc   : > { %v719_v2 = vadd.f32 %v718_v59, %v717_v51  ;;  %v736_v6 = vrot.slane %v735_v61, 2  ;;  %v2470_v51 = vpack.c.bf16 %v1088_v48, %v1086_v47  ;;  %v1092_v59 = vld [vmem:[#allocation7 + $0x278] sm:$0xff]  ;;  %v1127_v39 = vld [vmem:[#allocation7 + $0x390] sm:$0xff] }
 0x1cd   : > { %v730_v7 = vadd.f32 %v729_v1, %v728_v58  ;;  %v713_v13 = vrot.slane %v712_v62, 1  ;;  %v1090_v58 = vld [vmem:[#allocation7 + $0x268] sm:$0xff]  ;;  %v1089_v1 = vld [vmem:[#allocation7 + $0x260] sm:$0xff]  ;;  %v1112_v47 = vld [vmem:[#allocation7 + $0x318] sm:$0xff] }
 0x1ce   : > { %v720_v10 = vrot.slane %v719_v2, 1  ;;  %v737_v11 = vadd.f32 %v736_v6, %v735_v61  ;;  %v2472_v61 = vpack.c.bf16 %v1087_v54, %v1085_v53  ;;  %v1094_v6 = vld [vmem:[#allocation7 + $0x288] sm:$0xff]  ;;  %v1111_v53 = vld [vmem:[#allocation7 + $0x310] sm:$0xff] }
 0x1cf   : > { %v731_v15 = vrot.slane %v730_v7, 1  ;;  %v714_v24 = vadd.f32 %v713_v13, %v712_v62  ;;  %v2474_v62 = vpack.c.bf16 %v1092_v59, %v1090_v58  ;;  %v1093_v13 = vld [vmem:[#allocation7 + $0x280] sm:$0xff]  ;;  %v1114_v54 = vld [vmem:[#allocation7 + $0x328] sm:$0xff]  ;;  %v1116_v58 = vld [vmem:[#allocation7 + $0x338] sm:$0xff] }
 0x1d0   : > { %v738_v16 = vrot.slane %v737_v11, 1  ;;  %v721_v21 = vadd.f32 %v720_v10, %v719_v2  ;;  %v1091_v2 = vld [vmem:[#allocation7 + $0x270] sm:$0xff] }
 0x1d1   : > { %v732_v17 = vadd.f32 %v731_v15, %v730_v7  ;;  %v1096_v7 = vld [vmem:[#allocation7 + $0x298] sm:$0xff]  ;;  %v2476_v10 = vpack.c.bf16 %v1091_v2, %v1089_v1  ;;  %v1095_v15 = vld [vmem:[#allocation7 + $0x290] sm:$0xff]  ;;  %v1118_v2 = vld [vmem:[#allocation7 + $0x348] sm:$0xff] }
 0x1d2   : > { %v739_v22 = vadd.f32 %v738_v16, %v737_v11  ;;  %v2478_v11 = vpack.c.bf16 %v1096_v7, %v1094_v6  ;;  %v1098_v16 = vld [vmem:[#allocation7 + $0x2a8] sm:$0xff]  ;;  %v1115_v1 = vld [vmem:[#allocation7 + $0x330] sm:$0xff]  ;;  %v1120_v6 = vld [vmem:[#allocation7 + $0x358] sm:$0xff] }
 0x1d3   : > { %v740_v30 = vsel %vm349_vm0, %v714_v24, %v732_v17  ;;  %v1100_v17 = vld [vmem:[#allocation7 + $0x2b8] sm:$0xff]  ;;  %v1097_v24 = vld [vmem:[#allocation7 + $0x2a0] sm:$0xff] }
 0x1d4   : > { %v741_v29 = vsel %vm349_vm0, %v721_v21, %v739_v22  ;;  %v2480_v21 = vpack.c.bf16 %v1095_v15, %v1093_v13  ;;  %v2482_v22 = vpack.c.bf16 %v1100_v17, %v1098_v16  ;;  %v1119_v13 = vld [vmem:[#allocation7 + $0x350] sm:$0xff]  ;;  %v1122_v15 = vld [vmem:[#allocation7 + $0x368] sm:$0xff]  ;;  %v1124_v16 = vld [vmem:[#allocation7 + $0x378] sm:$0xff] }
 0x1d5   : > { %838 = vmatprep.mubr.f32.mxu1 %v741_v29  ;;  %v1099_v29 = vld [vmem:[#allocation7 + $0x2b0] sm:$0xff] }
 0x1d6   : > { %839 = vmatmul.mubr.f32.vlgmr.msra.gmra.mrb[0].mxu1 %v740_v30  ;;  %v1102_v30 = vld [vmem:[#allocation7 + $0x2c8] sm:$0xff]  ;;  %v2484_v35 = vpack.c.bf16 %v1099_v29, %v1097_v24  ;;  %v1123_v24 = vld [vmem:[#allocation7 + $0x370] sm:$0xff] }
 0x1d7   : > { %2465 = vmatpush1.bf16.msra.mxu1 %v2464_v44  ;;  %v2486_v37 = vpack.c.bf16 %v1104_v31, %v1102_v30  ;;  %v2490_v44 = vpack.c.bf16 %v1108_v42, %v1106_v41  ;;  %v1126_v29 = vld [vmem:[#allocation7 + $0x388] sm:$0xff]  ;;  %v1128_v30 = vld [vmem:[#allocation7 + $0x398] sm:$0xff] }
 0x1d8   : > { %2467 = vmatprep.subr.bf16.mxu1 %v2466_v45  ;;  %v1105_v45 = vld [vmem:[#allocation7 + $0x2e0] sm:$0xff] }
 0x1d9   : > { %v2492_v48 = vpack.c.bf16 %v1107_v56, %v1105_v45 }
 0x1db   : > { %2469 = vmatpush1.bf16.msra.mxu1 %v2468_v50  ;;  %v2494_v50 = vpack.c.bf16 %v1112_v47, %v1110_v12 }
 0x1dc   : > { %2471 = vmatprep.subr.bf16.mxu1 %v2470_v51  ;;  %v1109_v51 = vld [vmem:[#allocation7 + $0x300] sm:$0xff] }
 0x1dd   : > { %v2496_v59 = vpack.c.bf16 %v1111_v53, %v1109_v51  ;;  %v1130_v53 = vld [vmem:[#allocation7 + $0x3a8] sm:$0xff] }
 0x1df   : > { %2473 = vmatpush1.bf16.msra.mxu1 %v2472_v61  ;;  %v2498_v61 = vpack.c.bf16 %v1116_v58, %v1114_v54  ;;  %v1132_v54 = vld [vmem:[#allocation7 + $0x3b8] sm:$0xff] }
 0x1e0   : > { %2475 = vmatprep.subr.bf16.mxu1 %v2474_v62  ;;  %v1113_v62 = vld [vmem:[#allocation7 + $0x320] sm:$0xff]  ;;  %v2514_v58 = vpack.c.bf16 %v1132_v54, %v1130_v53 }
 0x1e1   : > { %v2500_v7 = vpack.c.bf16 %v1115_v1, %v1113_v62  ;;  %v1134_v1 = vld [vmem:[#allocation7 + $0x3c8] sm:$0xff] }
 0x1e3   : > { %2477 = vmatpush1.bf16.msra.mxu1 %v2476_v10  ;;  %v2502_v10 = vpack.c.bf16 %v1120_v6, %v1118_v2  ;;  %v1136_v2 = vld [vmem:[#allocation7 + $0x3d8] sm:$0xff] }
 0x1e4   : > { %2479 = vmatprep.subr.bf16.mxu1 %v2478_v11  ;;  %v1117_v11 = vld [vmem:[#allocation7 + $0x340] sm:$0xff]  ;;  %v2518_v6 = vpack.c.bf16 %v1136_v2, %v1134_v1 }
 0x1e5   : > { %v2504_v17 = vpack.c.bf16 %v1119_v13, %v1117_v11  ;;  %v1138_v13 = vld [vmem:[#allocation7 + $0x3e8] sm:$0xff]  ;;  %v1012_v1 = vld [vmem:[#allocation7] sm:$0xff] }
 0x1e7   : > { %2481 = vmatpush1.bf16.msra.mxu1 %v2480_v21  ;;  %v2506_v21 = vpack.c.bf16 %v1124_v16, %v1122_v15  ;;  %v1140_v15 = vld [vmem:[#allocation7 + $0x3f8] sm:$0xff] }
 0x1e8   : > { %2483 = vmatprep.subr.bf16.mxu1 %v2482_v22  ;;  %v1121_v22 = vld [vmem:[#allocation7 + $0x360] sm:$0xff]  ;;  %v2522_v16 = vpack.c.bf16 %v1140_v15, %v1138_v13 }
 0x1e9   : > { %v2508_v31 = vpack.c.bf16 %v1123_v24, %v1121_v22  ;;  %v1013_v24 = vld [vmem:[#allocation7 + $0x8] sm:$0xff] }
 0x1eb   : > { %2485 = vmatpush1.bf16.msra.mxu1 %v2484_v35  ;;  %v2510_v35 = vpack.c.bf16 %v1128_v30, %v1126_v29  ;;  %v1015_v29 = vld [vmem:[#allocation7 + $0x18] sm:$0xff] }
 0x1ec   : > { %2487 = vmatprep.subr.bf16.mxu1 %v2486_v37  ;;  %v1125_v37 = vld [vmem:[#allocation7 + $0x380] sm:$0xff]  ;;  %v2526_v30 = vpack.c.bf16 %v1015_v29, %v1013_v24  ;;  %v1018_v24 = vld [vmem:[#allocation7 + $0x30] sm:$0xff] }
 0x1ed   : > { %v2512_v40 = vpack.c.bf16 %v1127_v39, %v1125_v37  ;;  %v982_v39 = vsub.s32 2, %v3496_v25 }
 0x1ef   : > { %2489 = vmatpush1.bf16.msra.mxu1 %v2488_v43  ;;  %v987_v54 = vrot.slane %v3503_v28, %v982_v39 }
 0x1f0   : > { %2491 = vmatprep.subr.bf16.mxu1 %v2490_v44 }
 0x1f3   : > { %2493 = vmatpush1.bf16.msra.mxu1 %v2492_v48 }
 0x1f4   : > { %2495 = vmatprep.subr.bf16.mxu1 %v2494_v50 }
 0x1f7   : > { %2497 = vmatpush1.bf16.msra.mxu1 %v2496_v59  ;;  %v1129_v59 = vld [vmem:[#allocation7 + $0x3a0] sm:$0xff] }
 0x1f8   : > { %2499 = vmatprep.subr.bf16.mxu1 %v2498_v61  ;;  %v1131_v61 = vld [vmem:[#allocation7 + $0x3b0] sm:$0xff] }
 0x1f9   : > { %v2516_v62 = vpack.c.bf16 %v1131_v61, %v1129_v59 }
 0x1fb   : > { %2501 = vmatpush1.bf16.msra.mxu1 %v2500_v7  ;;  %v1133_v7 = vld [vmem:[#allocation7 + $0x3c0] sm:$0xff] }
 0x1fc   : > { %2503 = vmatprep.subr.bf16.mxu1 %v2502_v10  ;;  %v1135_v10 = vld [vmem:[#allocation7 + $0x3d0] sm:$0xff] }
 0x1fd   : > { %v2520_v11 = vpack.c.bf16 %v1135_v10, %v1133_v7  ;;  %v1017_v10 = vld [vmem:[#allocation7 + $0x28] sm:$0xff] }
 0x1ff   : > { %2505 = vmatpush1.bf16.msra.mxu1 %v2504_v17  ;;  %v1137_v17 = vld [vmem:[#allocation7 + $0x3e0] sm:$0xff] }
 0x200   : > { %2507 = vmatprep.subr.bf16.mxu1 %v2506_v21  ;;  %v1139_v21 = vld [vmem:[#allocation7 + $0x3f0] sm:$0xff] }
 0x201   : > { %v2524_v22 = vpack.c.bf16 %v1139_v21, %v1137_v17 }
 0x203   : > { %2509 = vmatpush1.bf16.msra.mxu1 %v2508_v31  ;;  %v3560_v31 = vsub.s32 1, %v3496_v25 }
 0x204   : > { %2511 = vmatprep.subr.bf16.mxu1 %v2510_v35 }
 0x207   : > { %2513 = vmatpush1.bf16.msra.mxu1 %v2512_v40 }
 0x208   : > { %2515 = vmatprep.subr.bf16.mxu1 %v2514_v58 }
 0x20b   : > { %2517 = vmatpush1.bf16.msra.mxu1 %v2516_v62 }
 0x20c   : > { %2519 = vmatprep.subr.bf16.mxu1 %v2518_v6 }
 0x20f   : > { %2521 = vmatpush1.bf16.msra.mxu1 %v2520_v11  ;;  %v1019_v11 = vld [vmem:[#allocation7 + $0x38] sm:$0xff] }
 0x210   : > { %2523 = vmatprep.subr.bf16.mxu1 %v2522_v16  ;;  %v2530_v17 = vpack.c.bf16 %v1019_v11, %v1017_v10  ;;  %v1039_v10 = vld [vmem:[#allocation7 + $0xd8] sm:$0xff] }
 0x213   : > { %2525 = vmatpush1.bf16.msra.mxu1 %v2524_v22  ;;  %v1016_v22 = vld [vmem:[#allocation7 + $0x20] sm:$0xff] }
 0x214   : > { %2527 = vmatprep.subr.bf16.mxu1 %v2526_v30  ;;  %v1021_v30 = vld [vmem:[#allocation7 + $0x48] sm:$0xff] }
 0x2a9   : > { %v2261_v41 = vpop.f32.mrb[0].mxu1 }
 0x2aa   : > { %v2262_v42 = vpop.f32.mrb[1].mxu1 }
 0x2ab   : > { %v2263_v43 = vadd.f32 %v2262_v42, %v2261_v41 }
 0x2ad   : > { %v844_v44 = vmul.f32 0.00048828125, %v2263_v43 }
 0x2af   : > { %v845_v45 = vmul.f32 %v844_v44, %v844_v44 }
 0x2b1   : > { %v847_v56 = vrot.slane %v845_v45, 7  ;;  %v971_v45 = vrot.slane %v3501_v27, %v3560_v31 }
 0x2b3   : > { %v849_v12 = vsub.f32 %v844_v44, %v847_v56 }
 0x2b5   : > { %v850_v47 = vmax.f32 %v849_v12, 0.0 }
 0x2b7   : > { %v851_v48 = vadd.f32 1e-05, %v850_v47 }
 0x2b9   : > { %2850 = vrsqrt.f32 %v851_v48  ;;  %v975_v48 = vrot.slane %v3503_v28, %v3560_v31 }
 0x2c3   : > { %v2851_v50 = vpop.eup %2850 }
 0x2c4   : > { %v853_v51 = vsel %vm349_vm0, %v844_v44, %v2851_v50 }
 0x2c5   : > { %2207 = vmatmul.mubr.msk.f32.vlgmr.msra.gmra.mrb[4].mxu0 %vm864_vm4, %v853_v51 }
 0x2c6   : > { %2657 = vmatpush3.bf16.msra.mxu0 %v3341_v5 }
 0x2c7   : > { %2659 = vmatprep.subr.bf16.mxu0 %v3350_v8 }
 0x2ca   : > { %2661 = vmatpush3.bf16.msra.mxu0 %v3364_v18 }
 0x2cb   : > { %2663 = vmatprep.subr.bf16.mxu0 %v3394_v46 }
 0x2ce   : > { %2665 = vmatpush3.bf16.msra.mxu0 %v3402_v49 }
 0x2cf   : > { %2667 = vmatprep.subr.bf16.mxu0 %v3412_v52 }
 0x2d2   : > { %2669 = vmatpush3.bf16.msra.mxu0 %v3420_v55 }
 0x2d3   : > { %2671 = vmatprep.subr.bf16.mxu0 %v3430_v60 }
 0x2d6   : > { %2673 = vmatpush3.bf16.msra.mxu0 %v3438_v63 }
 0x2d7   : > { %2675 = vmatprep.subr.bf16.mxu0 %v3448_v3 }
 0x2da   : > { %2677 = vmatpush3.bf16.msra.mxu0 %v3456_v9 }
 0x2db   : > { %2679 = vmatprep.subr.bf16.mxu0 %v3468_v14 }
 0x2de   : > { %2681 = vmatpush3.bf16.msra.mxu0 %v3480_v19 }
 0x2df   : > { %2683 = vmatprep.subr.bf16.mxu0 %v3483_v20 }
 0x2e2   : > { %2685 = vmatpush3.bf16.msra.mxu0 %v3492_v23 }
 0x2e3   : > { %2214 = vmatprep.subr.msk.mxu0 %vm868_vm3, %v3534_v32 }
 0x398   : > { %v939_v35 = vpop.f32.mrb[4].mxu0 }
 0x399   : > { %v947_v37 = vrot.slane %v939_v35, %v3499_v26  ;;  %v941_v40 = vpop.f32.mrb[5].mxu0  ;;  %v959_v44 = vrot.slane %v939_v35, %v3560_v31  ;;  %v1023_v35 = vld [vmem:[#allocation7 + $0x58] sm:$0xff] }
 0x39a   : > { %v951_v41 = vrot.slane %v941_v40, %v3499_v26  ;;  %v963_v47 = vrot.slane %v941_v40, %v3560_v31 }
 0x39b   : > { %v952_v42 = vsub.f32 %v3509_v33, %v947_v37  ;;  %v954_v43 = vsub.f32 %v3513_v36, %v947_v37  ;;  %v983_v33 = vrot.slane %v3501_v27, %v982_v39 }
 0x39c   : > { %v953_v56 = vsub.f32 %v3511_v34, %v951_v41  ;;  %v955_v12 = vsub.f32 %v3515_v38, %v951_v41  ;;  %v1014_v38 = vld [vmem:[#allocation7 + $0x10] sm:$0xff]  ;;  %v2532_v41 = vpack.c.bf16 %v1018_v24, %v1016_v22  ;;  %v1041_v24 = vld [vmem:[#allocation7 + $0xe8] sm:$0xff] }
 0x39d   : > { %v964_v50 = vmul.f32 %v959_v44, %v952_v42  ;;  %v966_v51 = vmul.f32 %v959_v44, %v954_v43  ;;  %v2528_v16 = vpack.c.bf16 %v1014_v38, %v1012_v1  ;;  %v2534_v43 = vpack.c.bf16 %v1023_v35, %v1021_v30  ;;  %v1020_v44 = vld [vmem:[#allocation7 + $0x40] sm:$0xff]  ;;  %v1038_v22 = vld [vmem:[#allocation7 + $0xd0] sm:$0xff] }
 0x39e   : > { %v965_v53 = vmul.f32 %v963_v47, %v953_v56  ;;  %v967_v36 = vmul.f32 %v963_v47, %v955_v12  ;;  %v1025_v12 = vld [vmem:[#allocation7 + $0x68] sm:$0xff]  ;;  %v1027_v47 = vld [vmem:[#allocation7 + $0x78] sm:$0xff] }
 0x39f   : > { %v976_v58 = vmul.f32 %v971_v45, %v964_v50  ;;  %v978_v59 = vmul.f32 %v971_v45, %v966_v51  ;;  %v1022_v45 = vld [vmem:[#allocation7 + $0x50] sm:$0xff]  ;;  %v2538_v50 = vpack.c.bf16 %v1027_v47, %v1025_v12  ;;  %v1024_v51 = vld [vmem:[#allocation7 + $0x60] sm:$0xff] }
 0x3a0   : > { %v977_v61 = vmul.f32 %v975_v48, %v965_v53  ;;  %v979_v62 = vmul.f32 %v975_v48, %v967_v36  ;;  %v2536_v48 = vpack.c.bf16 %v1022_v45, %v1020_v44  ;;  %v1029_v53 = vld [vmem:[#allocation7 + $0x88] sm:$0xff]  ;;  %v1031_v36 = vld [vmem:[#allocation7 + $0x98] sm:$0xff]  ;;  %v1044_v47 = vld [vmem:[#allocation7 + $0x100] sm:$0xff] }
 0x3a1   : > { %v988_v34 = vadd.f32 %v983_v33, %v976_v58  ;;  %v990_v2 = vadd.f32 %v983_v33, %v978_v59  ;;  %v1026_v33 = vld [vmem:[#allocation7 + $0x70] sm:$0xff]  ;;  %v2542_v58 = vpack.c.bf16 %v1031_v36, %v1029_v53  ;;  %v1028_v59 = vld [vmem:[#allocation7 + $0x80] sm:$0xff]  ;;  %v1047_v44 = vld [vmem:[#allocation7 + $0x118] sm:$0xff] }
 0x3a2   : > { %v989_v6 = vadd.f32 %v987_v54, %v977_v61  ;;  %v991_v7 = vadd.f32 %v987_v54, %v979_v62  ;;  %v2540_v54 = vpack.c.bf16 %v1026_v33, %v1024_v51  ;;  %v1030_v61 = vld [vmem:[#allocation7 + $0x90] sm:$0xff]  ;;  %v1033_v62 = vld [vmem:[#allocation7 + $0xa8] sm:$0xff]  ;;  %v1051_v51 = vld [vmem:[#allocation7 + $0x138] sm:$0xff] }
 0x3a3   : > { %v3577_v13 = vmax.f32 %v988_v34, 0.0  ;;  %v3579_v15 = vmax.f32 %v990_v2, 0.0  ;;  %v1035_v34 = vld [vmem:[#allocation7 + $0xb8] sm:$0xff]  ;;  %v2544_v1 = vpack.c.bf16 %v1030_v61, %v1028_v59  ;;  %v1032_v2 = vld [vmem:[#allocation7 + $0xa0] sm:$0xff] }
 0x3a4   : > { %v3581_v27 = vmax.f32 %v989_v6, 0.0  ;;  %v3583_v28 = vmax.f32 %v991_v7, 0.0  ;;  %v2546_v38 = vpack.c.bf16 %v1035_v34, %v1033_v62  ;;  %v1034_v6 = vld [vmem:[#allocation7 + $0xb0] sm:$0xff]  ;;  %v1037_v7 = vld [vmem:[#allocation7 + $0xc8] sm:$0xff]  ;;  %v1048_v36 = vld [vmem:[#allocation7 + $0x120] sm:$0xff] }
 0x3a5   : > { %v1296_v21 = vrot.slane %v3579_v15, 1  ;;  %v1295_v29 = vrot.slane %v3577_v13, 1  ;;  %v2548_v11 = vpack.c.bf16 %v1034_v6, %v1032_v2  ;;  %v1055_v59 = vld [vmem:[#allocation7 + $0x158] sm:$0xff]  ;;  %v1052_v34 = vld [vmem:[#allocation7 + $0x140] sm:$0xff] }
 0x3a6   : > { %1205 = vmatprep.mubr.f32.mxu1 %v3581_v27  ;;  %v1298_v37 = vrot.slane %v3581_v27, 1  ;;  %v1299_v39 = vrot.slane %v3583_v28, 1  ;;  %v1001_v56 = vrot.slane %v3581_v27, 7  ;;  %v1059_v2 = vld [vmem:[#allocation7 + $0x178] sm:$0xff] }
 0x3a7   : > { %1206 = vmatmul.mubr.f32.vlgmr.msra.gmra.mrb[2].mxu1 %v3577_v13  ;;  %v3594_v40 = vsel %vm575_vm2, %v1295_v29, %v1296_v21  ;;  %v1043_v29 = vld [vmem:[#allocation7 + $0xf8] sm:$0xff] }
 0x3a8   : > { %2529 = vmatpush1.bf16.msra.mxu1 %v2528_v16  ;;  %1211 = vmatprep.mubr.f32.mxu1 %v3583_v28  ;;  %v3600_v42 = vsel %vm575_vm2, %v1298_v37, %v1299_v39  ;;  %v2550_v16 = vpack.c.bf16 %v1039_v10, %v1037_v7  ;;  %v2554_v35 = vpack.c.bf16 %v1043_v29, %v1041_v24  ;;  %v1040_v37 = vld [vmem:[#allocation7 + $0xe0] sm:$0xff] }
 0x3a9   : > { %2531 = vmatprep.subr.bf16.mxu1 %v2530_v17  ;;  %v1036_v17 = vld [vmem:[#allocation7 + $0xc0] sm:$0xff] }
 0x3aa   : > { %v2552_v30 = vpack.c.bf16 %v1038_v22, %v1036_v17  ;;  %v1056_v10 = vld [vmem:[#allocation7 + $0x160] sm:$0xff]  ;;  %v1063_v17 = vld [vmem:[#allocation7 + $0x198] sm:$0xff] }
 0x3ab   : > { %1212 = vmatmul.mubr.f32.gmra.mrb[4].mxu1 %v3579_v15  ;;  %v1060_v29 = vld [vmem:[#allocation7 + $0x180] sm:$0xff] }
 0x3ac   : > { %2533 = vmatpush1.bf16.msra.mxu1 %v2532_v41  ;;  %2209 = vmatprep.mubr.msk.f32.mxu1 %vm3372_vm1, %v1001_v56  ;;  %v1042_v41 = vld [vmem:[#allocation7 + $0xf0] sm:$0xff] }
 0x3ad   : > { %2535 = vmatprep.subr.bf16.mxu1 %v2534_v43  ;;  %v1045_v43 = vld [vmem:[#allocation7 + $0x108] sm:$0xff]  ;;  %v2556_v45 = vpack.c.bf16 %v1042_v41, %v1040_v37  ;;  %v1067_v37 = vld [vmem:[#allocation7 + $0x1b8] sm:$0xff] }
 0x3ae   : > { %v2558_v12 = vpack.c.bf16 %v1047_v44, %v1045_v43  ;;  %v1064_v44 = vld [vmem:[#allocation7 + $0x1a0] sm:$0xff] }
 0x3b0   : > { %2537 = vmatpush1.bf16.msra.mxu1 %v2536_v48  ;;  %v1046_v48 = vld [vmem:[#allocation7 + $0x110] sm:$0xff] }
 0x3b1   : > { %2539 = vmatprep.subr.bf16.mxu1 %v2538_v50  ;;  %v1049_v50 = vld [vmem:[#allocation7 + $0x128] sm:$0xff]  ;;  %v2560_v33 = vpack.c.bf16 %v1046_v48, %v1044_v47  ;;  %v1071_v47 = vld [vmem:[#allocation7 + $0x1d8] sm:$0xff] }
 0x3b2   : > { %v2562_v53 = vpack.c.bf16 %v1051_v51, %v1049_v50  ;;  %v1068_v51 = vld [vmem:[#allocation7 + $0x1c0] sm:$0xff] }
 0x3b4   : > { %2541 = vmatpush1.bf16.msra.mxu1 %v2540_v54  ;;  %v1050_v54 = vld [vmem:[#allocation7 + $0x130] sm:$0xff] }
 0x3b5   : > { %2543 = vmatprep.subr.bf16.mxu1 %v2542_v58  ;;  %v1053_v58 = vld [vmem:[#allocation7 + $0x148] sm:$0xff]  ;;  %v2564_v61 = vpack.c.bf16 %v1050_v54, %v1048_v36  ;;  %v1075_v36 = vld [vmem:[#allocation7 + $0x1f8] sm:$0xff] }
 0x3b6   : > { %v2566_v62 = vpack.c.bf16 %v1055_v59, %v1053_v58  ;;  %v1072_v59 = vld [vmem:[#allocation7 + $0x1e0] sm:$0xff] }
 0x3b8   : > { %2545 = vmatpush1.bf16.msra.mxu1 %v2544_v1  ;;  %v1054_v1 = vld [vmem:[#allocation7 + $0x150] sm:$0xff] }
 0x3b9   : > { %2547 = vmatprep.subr.bf16.mxu1 %v2546_v38  ;;  %v1057_v38 = vld [vmem:[#allocation7 + $0x168] sm:$0xff]  ;;  %v2568_v6 = vpack.c.bf16 %v1054_v1, %v1052_v34  ;;  %v1311_v34 = vld [vmem:[#allocation7 + $0x418] sm:$0xff] }
 0x3ba   : > { %v2570_v7 = vpack.c.bf16 %v1059_v2, %v1057_v38  ;;  %v1308_v2 = vld [vmem:[#allocation7 + $0x400] sm:$0xff] }
 0x3bc   : > { %2549 = vmatpush1.bf16.msra.mxu1 %v2548_v11  ;;  %v1058_v11 = vld [vmem:[#allocation7 + $0x170] sm:$0xff] }
 0x3bd   : > { %2551 = vmatprep.subr.bf16.mxu1 %v2550_v16  ;;  %v1061_v16 = vld [vmem:[#allocation7 + $0x188] sm:$0xff]  ;;  %v2572_v22 = vpack.c.bf16 %v1058_v11, %v1056_v10  ;;  %v1315_v10 = vld [vmem:[#allocation7 + $0x438] sm:$0xff]  ;;  %v1004_v11 = vrot.slane %v3583_v28, 7 }
 0x3be   : > { %v2574_v24 = vpack.c.bf16 %v1063_v17, %v1061_v16  ;;  %v1000_v17 = vrot.slane %v3577_v13, 7 }
 0x3c0   : > { %2553 = vmatpush1.bf16.msra.mxu1 %v2552_v30  ;;  %v1062_v30 = vld [vmem:[#allocation7 + $0x190] sm:$0xff] }
 0x3c1   : > { %2555 = vmatprep.subr.bf16.mxu1 %v2554_v35  ;;  %v1065_v35 = vld [vmem:[#allocation7 + $0x1a8] sm:$0xff]  ;;  %v2576_v41 = vpack.c.bf16 %v1062_v30, %v1060_v29  ;;  %v1314_v29 = vld [vmem:[#allocation7 + $0x430] sm:$0xff]  ;;  %v1002_v30 = vrot.slane %v3579_v15, 7 }
 0x3c2   : > { %v2578_v43 = vpack.c.bf16 %v1067_v37, %v1065_v35  ;;  %v1317_v35 = vld [vmem:[#allocation7 + $0x448] sm:$0xff]  ;;  %v1319_v37 = vld [vmem:[#allocation7 + $0x458] sm:$0xff] }
 0x3c3   : > { %v2598_v13 = vpack.c.bf16 %v1319_v37, %v1317_v35  ;;  %v1341_v35 = vld [vmem:[#allocation7 + $0x508] sm:$0xff]  ;;  %v1343_v37 = vld [vmem:[#allocation7 + $0x518] sm:$0xff] }
 0x3c4   : > { %2557 = vmatpush1.bf16.msra.mxu1 %v2556_v45  ;;  %v1066_v45 = vld [vmem:[#allocation7 + $0x1b0] sm:$0xff] }
 0x3c5   : > { %2559 = vmatprep.subr.bf16.mxu1 %v2558_v12  ;;  %v1069_v12 = vld [vmem:[#allocation7 + $0x1c8] sm:$0xff]  ;;  %v2580_v48 = vpack.c.bf16 %v1066_v45, %v1064_v44  ;;  %v1316_v44 = vld [vmem:[#allocation7 + $0x440] sm:$0xff]  ;;  %v1318_v45 = vld [vmem:[#allocation7 + $0x450] sm:$0xff] }
 0x3c6   : > { %v2582_v50 = vpack.c.bf16 %v1071_v47, %v1069_v12  ;;  %v1003_v12 = vsel %vm349_vm0, %v1000_v17, %v1002_v30  ;;  %v1321_v47 = vld [vmem:[#allocation7 + $0x468] sm:$0xff]  ;;  %v2600_v57 = vpack.c.bf16 %v1318_v45, %v1316_v44  ;;  %v1338_v30 = vld [vmem:[#allocation7 + $0x4f0] sm:$0xff] }
 0x3c7   : > { %v1342_v44 = vld [vmem:[#allocation7 + $0x510] sm:$0xff]  ;;  %v1345_v45 = vld [vmem:[#allocation7 + $0x528] sm:$0xff] }
 0x3c8   : > { %2561 = vmatpush1.bf16.msra.mxu1 %v2560_v33  ;;  %v1070_v33 = vld [vmem:[#allocation7 + $0x1d0] sm:$0xff] }
 0x3c9   : > { %2563 = vmatprep.subr.bf16.mxu1 %v2562_v53  ;;  %v1073_v53 = vld [vmem:[#allocation7 + $0x1e8] sm:$0xff]  ;;  %v2584_v54 = vpack.c.bf16 %v1070_v33, %v1068_v51  ;;  %v1327_v33 = vld [vmem:[#allocation7 + $0x498] sm:$0xff] }
 0x3ca   : > { %v2586_v58 = vpack.c.bf16 %v1075_v36, %v1073_v53  ;;  %v1325_v51 = vld [vmem:[#allocation7 + $0x488] sm:$0xff] }
 0x3cb   : > { %v2606_v36 = vpack.c.bf16 %v1327_v33, %v1325_v51 }
 0x3cc   : > { %2565 = vmatpush1.bf16.msra.mxu1 %v2564_v61  ;;  %v1074_v61 = vld [vmem:[#allocation7 + $0x1f0] sm:$0xff] }
 0x3cd   : > { %2567 = vmatprep.subr.bf16.mxu1 %v2566_v62  ;;  %v1309_v62 = vld [vmem:[#allocation7 + $0x408] sm:$0xff]  ;;  %v2588_v1 = vpack.c.bf16 %v1074_v61, %v1072_v59  ;;  %v1331_v61 = vld [vmem:[#allocation7 + $0x4b8] sm:$0xff] }
 0x3ce   : > { %v2590_v38 = vpack.c.bf16 %v1311_v34, %v1309_v62  ;;  %v1329_v59 = vld [vmem:[#allocation7 + $0x4a8] sm:$0xff] }
 0x3cf   : > { %v2610_v34 = vpack.c.bf16 %v1331_v61, %v1329_v59 }
 0x3d0   : > { %2569 = vmatpush1.bf16.msra.mxu1 %v2568_v6  ;;  %v1310_v6 = vld [vmem:[#allocation7 + $0x410] sm:$0xff] }
 0x3d1   : > { %2571 = vmatprep.subr.bf16.mxu1 %v2570_v7  ;;  %v1313_v7 = vld [vmem:[#allocation7 + $0x428] sm:$0xff]  ;;  %v2592_v16 = vpack.c.bf16 %v1310_v6, %v1308_v2  ;;  %v1335_v2 = vld [vmem:[#allocation7 + $0x4d8] sm:$0xff] }
 0x3d4   : > { %2573 = vmatpush1.bf16.msra.mxu1 %v2572_v22  ;;  %v2594_v22 = vpack.c.bf16 %v1315_v10, %v1313_v7  ;;  %v1332_v10 = vld [vmem:[#allocation7 + $0x4c0] sm:$0xff] }
 0x3d5   : > { %2575 = vmatprep.subr.bf16.mxu1 %v2574_v24  ;;  %v1312_v24 = vld [vmem:[#allocation7 + $0x420] sm:$0xff] }
 0x3d8   : > { %2577 = vmatpush1.bf16.msra.mxu1 %v2576_v41  ;;  %v1005_v41 = vsel %vm349_vm0, %v1001_v56, %v1004_v11  ;;  %v1322_v56 = vld [vmem:[#allocation7 + $0x470] sm:$0xff] }
 0x3d9   : > { %2579 = vmatprep.subr.bf16.mxu1 %v2578_v43  ;;  %v2596_v43 = vpack.c.bf16 %v1314_v29, %v1312_v24  ;;  %v1334_v11 = vld [vmem:[#allocation7 + $0x4d0] sm:$0xff]  ;;  %v1336_v29 = vld [vmem:[#allocation7 + $0x4e0] sm:$0xff] }
 0x3dc   : > { %2581 = vmatpush1.bf16.msra.mxu1 %v2580_v48  ;;  %v1323_v48 = vld [vmem:[#allocation7 + $0x478] sm:$0xff] }
 0x3dd   : > { %2583 = vmatprep.subr.bf16.mxu1 %v2582_v50  ;;  %v2602_v27 = vpack.c.bf16 %v1323_v48, %v1321_v47  ;;  %v1320_v50 = vld [vmem:[#allocation7 + $0x460] sm:$0xff] }
 0x3de   : > { %v2604_v53 = vpack.c.bf16 %v1322_v56, %v1320_v50  ;;  %v1349_v50 = vld [vmem:[#allocation7 + $0x548] sm:$0xff]  ;;  %v1351_v56 = vld [vmem:[#allocation7 + $0x558] sm:$0xff] }
 0x3df   : > { %v2630_v33 = vpack.c.bf16 %v1351_v56, %v1349_v50  ;;  %v3626_v50 = vld [vmem:[#allocation8] sm:$0xff] }
 0x3e0   : > { %2585 = vmatpush1.bf16.msra.mxu1 %v2584_v54  ;;  %v1324_v54 = vld [vmem:[#allocation7 + $0x480] sm:$0xff] }
 0x3e1   : > { %2587 = vmatprep.subr.bf16.mxu1 %v2586_v58  ;;  %v1326_v58 = vld [vmem:[#allocation7 + $0x490] sm:$0xff] }
 0x3e2   : > { %v2608_v62 = vpack.c.bf16 %v1326_v58, %v1324_v54  ;;  %v1353_v54 = vld [vmem:[#allocation7 + $0x568] sm:$0xff]  ;;  %v1355_v58 = vld [vmem:[#allocation7 + $0x578] sm:$0xff] }
 0x3e3   : > { %v2634_v61 = vpack.c.bf16 %v1355_v58, %v1353_v54 }
 0x3e4   : > { %2589 = vmatpush1.bf16.msra.mxu1 %v2588_v1  ;;  %v1330_v1 = vld [vmem:[#allocation7 + $0x4b0] sm:$0xff] }
 0x3e5   : > { %2591 = vmatprep.subr.bf16.mxu1 %v2590_v38  ;;  %v1333_v38 = vld [vmem:[#allocation7 + $0x4c8] sm:$0xff] }
 0x3e6   : > { %v2614_v7 = vpack.c.bf16 %v1335_v2, %v1333_v38 }
 0x3e7   : > { %2211 = vmatmul.mubr.msk.f32.vlgmr.msra.gmra.mrb[2].mxu1 %vm3372_vm1, %v1000_v17  ;;  %v1339_v17 = vld [vmem:[#allocation7 + $0x4f8] sm:$0xff] }
 0x3e8   : > { %1288 = vmatprep.mubr.f32.mxu1 %v1005_v41  ;;  %2593 = vmatpush1.bf16.msra.mxu1 %v2592_v16  ;;  %v1337_v16 = vld [vmem:[#allocation7 + $0x4e8] sm:$0xff]  ;;  %v2620_v41 = vpack.c.bf16 %v1338_v30, %v1336_v29  ;;  %v1367_v30 = vld [vmem:[#allocation7 + $0x5d8] sm:$0xff] }
 0x3e9   : > { %2595 = vmatprep.subr.bf16.mxu1 %v2594_v22  ;;  %v2616_v22 = vpack.c.bf16 %v1334_v11, %v1332_v10  ;;  %v2618_v24 = vpack.c.bf16 %v1339_v17, %v1337_v16  ;;  %v1361_v10 = vld [vmem:[#allocation7 + $0x5a8] sm:$0xff]  ;;  %v1363_v11 = vld [vmem:[#allocation7 + $0x5b8] sm:$0xff] }
 0x3ea   : > { %v2642_v17 = vpack.c.bf16 %v1363_v11, %v1361_v10  ;;  %v1365_v29 = vld [vmem:[#allocation7 + $0x5c8] sm:$0xff] }
 0x3eb   : > { %1289 = vmatmul.mubr.f32.gmra.mrb[4].mxu1 %v1003_v12  ;;  %v1347_v12 = vld [vmem:[#allocation7 + $0x538] sm:$0xff] }
 0x3ec   : > { %2597 = vmatpush1.bf16.msra.mxu1 %v2596_v43  ;;  %1436 = vmatprep.mubr.f32.mxu1 %v3600_v42  ;;  %v1328_v42 = vld [vmem:[#allocation7 + $0x4a0] sm:$0xff]  ;;  %v2622_v43 = vpack.c.bf16 %v1343_v37, %v1341_v35  ;;  %v2626_v48 = vpack.c.bf16 %v1347_v12, %v1345_v45  ;;  %v2646_v37 = vpack.c.bf16 %v1367_v30, %v1365_v29 }
 0x3ed   : > { %2599 = vmatprep.subr.bf16.mxu1 %v2598_v13  ;;  %v2612_v6 = vpack.c.bf16 %v1330_v1, %v1328_v42  ;;  %v1340_v13 = vld [vmem:[#allocation7 + $0x500] sm:$0xff]  ;;  %v1357_v42 = vld [vmem:[#allocation7 + $0x588] sm:$0xff]  ;;  %v1359_v1 = vld [vmem:[#allocation7 + $0x598] sm:$0xff] }
 0x3ee   : > { %v2624_v47 = vpack.c.bf16 %v1342_v44, %v1340_v13  ;;  %v2638_v2 = vpack.c.bf16 %v1359_v1, %v1357_v42  ;;  %v1369_v13 = vld [vmem:[#allocation7 + $0x5e8] sm:$0xff]  ;;  %v1371_v44 = vld [vmem:[#allocation7 + $0x5f8] sm:$0xff] }
 0x3ef   : > { %v2650_v12 = vpack.c.bf16 %v1371_v44, %v1369_v13 }
 0x3f0   : > { %2601 = vmatpush1.bf16.msra.mxu1 %v2600_v57  ;;  %v1344_v57 = vld [vmem:[#allocation7 + $0x520] sm:$0xff] }
 0x3f1   : > { %2603 = vmatprep.subr.bf16.mxu1 %v2602_v27  ;;  %v1346_v27 = vld [vmem:[#allocation7 + $0x530] sm:$0xff] }
 0x3f2   : > { %v2628_v51 = vpack.c.bf16 %v1346_v27, %v1344_v57  ;;  %v1455_v27 = vsub.s32 3, %v3496_v25 }
 0x3f4   : > { %2605 = vmatpush1.bf16.msra.mxu1 %v2604_v53  ;;  %v1348_v53 = vld [vmem:[#allocation7 + $0x540] sm:$0xff]  ;;  %v1456_v56 = vrot.slane %v3626_v50, %v1455_v27 }
 0x3f5   : > { %2607 = vmatprep.subr.bf16.mxu1 %v2606_v36  ;;  %v1350_v36 = vld [vmem:[#allocation7 + $0x550] sm:$0xff] }
 0x3f6   : > { %v2632_v59 = vpack.c.bf16 %v1350_v36, %v1348_v53 }
 0x3f8   : > { %2609 = vmatpush1.bf16.msra.mxu1 %v2608_v62  ;;  %v1352_v62 = vld [vmem:[#allocation7 + $0x560] sm:$0xff] }
 0x3f9   : > { %2611 = vmatprep.subr.bf16.mxu1 %v2610_v34  ;;  %v1354_v34 = vld [vmem:[#allocation7 + $0x570] sm:$0xff] }
 0x3fa   : > { %v2636_v38 = vpack.c.bf16 %v1354_v34, %v1352_v62 }
 0x3fc   : > { %2613 = vmatpush1.bf16.msra.mxu1 %v2612_v6  ;;  %v1356_v6 = vld [vmem:[#allocation7 + $0x580] sm:$0xff] }
 0x3fd   : > { %2615 = vmatprep.subr.bf16.mxu1 %v2614_v7  ;;  %v1358_v7 = vld [vmem:[#allocation7 + $0x590] sm:$0xff] }
 0x3fe   : > { %v2640_v16 = vpack.c.bf16 %v1358_v7, %v1356_v6 }
 0x400   : > { %2617 = vmatpush1.bf16.msra.mxu1 %v2616_v22  ;;  %v1360_v22 = vld [vmem:[#allocation7 + $0x5a0] sm:$0xff] }
 0x401   : > { %2619 = vmatprep.subr.bf16.mxu1 %v2618_v24  ;;  %v1362_v24 = vld [vmem:[#allocation7 + $0x5b0] sm:$0xff] }
 0x402   : > { %v2644_v35 = vpack.c.bf16 %v1362_v24, %v1360_v22 }
 0x404   : > { %2621 = vmatpush1.bf16.msra.mxu1 %v2620_v41  ;;  %v1364_v41 = vld [vmem:[#allocation7 + $0x5c0] sm:$0xff] }
 0x405   : > { %2623 = vmatprep.subr.bf16.mxu1 %v2622_v43  ;;  %v1366_v43 = vld [vmem:[#allocation7 + $0x5d0] sm:$0xff] }
 0x406   : > { %v2648_v45 = vpack.c.bf16 %v1366_v43, %v1364_v41 }
 0x408   : > { %2625 = vmatpush1.bf16.msra.mxu1 %v2624_v47  ;;  %v1368_v47 = vld [vmem:[#allocation7 + $0x5e0] sm:$0xff] }
 0x409   : > { %2627 = vmatprep.subr.bf16.mxu1 %v2626_v48  ;;  %v1370_v48 = vld [vmem:[#allocation7 + $0x5f0] sm:$0xff] }
 0x40a   : > { %v2652_v57 = vpack.c.bf16 %v1370_v48, %v1368_v47 }
 0x40c   : > { %2629 = vmatpush1.bf16.msra.mxu1 %v2628_v51 }
 0x40d   : > { %2631 = vmatprep.subr.bf16.mxu1 %v2630_v33  ;;  %v3629_v33 = vld [vmem:[#allocation8 + $0x8] sm:$0xff] }
 0x40e   : > { %v1460_v53 = vrot.slane %v3629_v33, %v1455_v27 }
 0x410   : > { %2633 = vmatpush1.bf16.msra.mxu1 %v2632_v59 }
 0x411   : > { %2635 = vmatprep.subr.bf16.mxu1 %v2634_v61 }
 0x414   : > { %2637 = vmatpush1.bf16.msra.mxu1 %v2636_v38 }
 0x415   : > { %2639 = vmatprep.subr.bf16.mxu1 %v2638_v2 }
 0x418   : > { %2641 = vmatpush1.bf16.msra.mxu1 %v2640_v16 }
 0x419   : > { %2643 = vmatprep.subr.bf16.mxu1 %v2642_v17 }
 0x41c   : > { %2645 = vmatpush1.bf16.msra.mxu1 %v2644_v35 }
 0x41d   : > { %2647 = vmatprep.subr.bf16.mxu1 %v2646_v37 }
 0x420   : > { %2649 = vmatpush1.bf16.msra.mxu1 %v2648_v45 }
 0x421   : > { %2651 = vmatprep.subr.bf16.mxu1 %v2650_v12 }
 0x424   : > { %2653 = vmatpush1.bf16.msra.mxu1 %v2652_v57 }
 0x427   : > { %1437 = vmatmul.mubr.f32.vlgmr.msra.gmra.mrb[2].mxu1 %v3594_v40 }
 0x428   : > { %2212 = vmatprep.mubr.msk.f32.mxu1 %vm575_vm2, %v1299_v39 }
 0x42b   : > { %2213 = vmatmul.mubr.msk.f32.gmra.mrb[4].mxu1 %vm575_vm2, %v1296_v21 }
 0x4fa   : > { %v1438_v51 = vpop.f32.mrb[2].mxu1 }
 0x4fb   : > { %v1440_v40 = vpop.f32.mrb[3].mxu1  ;;  %v3632_v36 = vadd.f32 %v1456_v56, %v1438_v51 }
 0x4fc   : > { %v3634_v28 = vadd.f32 %v1460_v53, %v1440_v40  ;;  %v3657_v40 = vld.sshfl [vmem:[%s3902_s6] sm:$0x33 pattern:$0x76325410] }
 0x4fd   : > { %v1479_v58 = vmul.f32 %v3632_v36, %v3632_v36 }
 0x4fe   : > { %v1444_v39 = vpop.f32.mrb[4].mxu1  ;;  %v1480_v62 = vmul.f32 %v3634_v28, %v3634_v28 }
 0x4ff   : > { %v3636_v15 = vadd.f32 %v1456_v56, %v1444_v39  ;;  %v1446_v21 = vpop.f32.mrb[5].mxu1  ;;  %v1706_v39 = vld [vmem:[%s3899_s3 + $0x8] sm:$0xff] }
 0x500   : > { %v3638_v54 = vadd.f32 %v1460_v53, %v1446_v21  ;;  %v1708_v21 = vld [vmem:[%s3899_s3 + $0x18] sm:$0xff] }
 0x501   : > { %v1465_v59 = vadd.f32 %v3636_v15, %v3632_v36  ;;  %v1481_v61 = vmul.f32 %v3636_v15, %v3636_v15 }
 0x502   : > { %v1472_v34 = vadd.f32 %v3638_v54, %v3634_v28  ;;  %v1482_v42 = vmul.f32 %v3638_v54, %v3638_v54 }
 0x503   : > { %v1466_v1 = vrot.slane %v1465_v59, 4  ;;  %v1483_v38 = vadd.f32 %v1481_v61, %v1479_v58  ;;  %v2686_v58 = vpack.c.bf16 %v1708_v21, %v1706_v39 }
 0x504   : > { %v1473_v2 = vrot.slane %v1472_v34, 4  ;;  %v1490_v6 = vadd.f32 %v1482_v42, %v1480_v62 }
 0x505   : > { %v1467_v7 = vadd.f32 %v1466_v1, %v1465_v59  ;;  %v1484_v10 = vrot.slane %v1483_v38, 4 }
 0x506   : > { %v1474_v11 = vadd.f32 %v1473_v2, %v1472_v34  ;;  %v1491_v16 = vrot.slane %v1490_v6, 4 }
 0x507   : > { %v1468_v17 = vrot.slane %v1467_v7, 2  ;;  %v1485_v22 = vadd.f32 %v1484_v10, %v1483_v38  ;;  %v1707_v10 = vld [vmem:[%s3899_s3 + $0x10] sm:$0xff] }
 0x508   : > { %v1475_v24 = vrot.slane %v1474_v11, 2  ;;  %v1492_v29 = vadd.f32 %v1491_v16, %v1490_v6  ;;  %v1712_v16 = vld [vmem:[%s3899_s3 + $0x38] sm:$0xff] }
 0x509   : > { %v1469_v30 = vadd.f32 %v1468_v17, %v1467_v7  ;;  %v1486_v35 = vrot.slane %v1485_v22, 2  ;;  %v1705_v7 = vld [vmem:[%s3899_s3] sm:$0xff] }
 0x50a   : > { %v1476_v37 = vadd.f32 %v1475_v24, %v1474_v11  ;;  %v1493_v41 = vrot.slane %v1492_v29, 2  ;;  %v1710_v11 = vld [vmem:[%s3899_s3 + $0x28] sm:$0xff]  ;;  %v2688_v17 = vpack.c.bf16 %v1707_v10, %v1705_v7 }
 0x50b   : > { %v1487_v43 = vadd.f32 %v1486_v35, %v1485_v22  ;;  %v1470_v45 = vrot.slane %v1469_v30, 1  ;;  %v2690_v24 = vpack.c.bf16 %v1712_v16, %v1710_v11  ;;  %v1729_v11 = vld [vmem:[%s3899_s3 + $0xc0] sm:$0xff]  ;;  %v1731_v16 = vld [vmem:[%s3899_s3 + $0xd0] sm:$0xff] }
 0x50c   : > { %v1477_v13 = vrot.slane %v1476_v37, 1  ;;  %v1494_v44 = vadd.f32 %v1493_v41, %v1492_v29  ;;  %v1709_v29 = vld [vmem:[%s3899_s3 + $0x20] sm:$0xff]  ;;  %v1716_v41 = vld [vmem:[%s3899_s3 + $0x58] sm:$0xff] }
 0x50d   : > { %v1488_v12 = vrot.slane %v1487_v43, 1  ;;  %v1471_v56 = vadd.f32 %v1470_v45, %v1469_v30  ;;  %v1711_v30 = vld [vmem:[%s3899_s3 + $0x30] sm:$0xff] }
 0x50e   : > { %v1495_v47 = vrot.slane %v1494_v44, 1  ;;  %v1478_v57 = vadd.f32 %v1477_v13, %v1476_v37  ;;  %v1714_v37 = vld [vmem:[%s3899_s3 + $0x48] sm:$0xff]  ;;  %v1715_v45 = vld [vmem:[%s3899_s3 + $0x50] sm:$0xff] }
 0x50f   : > { %v1489_v48 = vadd.f32 %v1488_v12, %v1487_v43  ;;  %v2692_v43 = vpack.c.bf16 %v1711_v30, %v1709_v29  ;;  %v2694_v13 = vpack.c.bf16 %v1716_v41, %v1714_v37  ;;  %v1718_v12 = vld [vmem:[%s3899_s3 + $0x68] sm:$0xff]  ;;  %v1733_v30 = vld [vmem:[%s3899_s3 + $0xe0] sm:$0xff] }
 0x510   : > { %v1496_v27 = vadd.f32 %v1495_v47, %v1494_v44  ;;  %v1713_v44 = vld [vmem:[%s3899_s3 + $0x40] sm:$0xff]  ;;  %v1720_v47 = vld [vmem:[%s3899_s3 + $0x78] sm:$0xff] }
 0x511   : > { %v1497_v53 = vsel %vm349_vm0, %v1471_v56, %v1489_v48  ;;  %v2696_v48 = vpack.c.bf16 %v1715_v45, %v1713_v44  ;;  %v1719_v56 = vld [vmem:[%s3899_s3 + $0x70] sm:$0xff] }
 0x512   : > { %v1498_v51 = vsel %vm349_vm0, %v1478_v57, %v1496_v27  ;;  %v2698_v57 = vpack.c.bf16 %v1720_v47, %v1718_v12  ;;  %v1717_v27 = vld [vmem:[%s3899_s3 + $0x60] sm:$0xff] }
 0x513   : > { %1563 = vmatprep.mubr.f32.mxu0 %v1498_v51  ;;  %v1722_v51 = vld [vmem:[%s3899_s3 + $0x88] sm:$0xff]  ;;  %v2700_v39 = vpack.c.bf16 %v1719_v56, %v1717_v27  ;;  %v2859_v41 = vld [vmem:[%s3309_s20] sm:$0xff] }
 0x514   : > { %1564 = vmatmul.mubr.f32.vlgmr.msra.gmra.mrb[6].mxu0 %v1497_v53  ;;  %v1724_v53 = vld [vmem:[%s3899_s3 + $0x98] sm:$0xff] }
 0x515   : > { %2215 = vmatpush1.msk.msra.mxu0 %vm868_vm3, %v3657_v40  ;;  %1646 = vmatprep.mubr.f32.mxu0 %v3059_v0  ;;  %v2702_v21 = vpack.c.bf16 %v1724_v53, %v1722_v51 }
 0x516   : > { %2687 = vmatprep.subr.bf16.mxu0 %v2686_v58  ;;  %v1721_v58 = vld [vmem:[%s3899_s3 + $0x80] sm:$0xff] }
 0x5e7   : > { %v2296_v59 = vpop.f32.mrb[6].mxu0 }
 0x5e8   : > { %v2297_v61 = vpop.f32.mrb[7].mxu0 }
 0x5e9   : > { %v2298_v62 = vadd.f32 %v2297_v61, %v2296_v59  ;;  %v1723_v59 = vld [vmem:[%s3899_s3 + $0x90] sm:$0xff]  ;;  %v1726_v61 = vld [vmem:[%s3899_s3 + $0xa8] sm:$0xff] }
 0x5eb   : > { %v1569_v34 = vmul.f32 0.00048828125, %v2298_v62  ;;  %v1728_v62 = vld [vmem:[%s3899_s3 + $0xb8] sm:$0xff] }
 0x5ed   : > { %v1570_v42 = vmul.f32 %v1569_v34, %v1569_v34 }
 0x5ef   : > { %v1572_v1 = vrot.slane %v1570_v42, 7  ;;  %v2706_v42 = vpack.c.bf16 %v1728_v62, %v1726_v61 }
 0x5f1   : > { %v1574_v38 = vsub.f32 %v1569_v34, %v1572_v1  ;;  %v1725_v1 = vld [vmem:[%s3899_s3 + $0xa0] sm:$0xff] }
 0x5f3   : > { %v1575_v2 = vmax.f32 %v1574_v38, 0.0  ;;  %v1727_v38 = vld [vmem:[%s3899_s3 + $0xb0] sm:$0xff] }
 0x5f4   : > { %v2708_v7 = vpack.c.bf16 %v1727_v38, %v1725_v1 }
 0x5f5   : > { %v1576_v6 = vadd.f32 1e-05, %v1575_v2  ;;  %v1730_v2 = vld [vmem:[%s3899_s3 + $0xc8] sm:$0xff] }
 0x5f7   : > { %2852 = vrsqrt.f32 %v1576_v6  ;;  %v1732_v6 = vld [vmem:[%s3899_s3 + $0xd8] sm:$0xff] }
 0x5f8   : > { %v2710_v10 = vpack.c.bf16 %v1732_v6, %v1730_v2 }
 0x601   : > { %v2853_v22 = vpop.eup %2852 }
 0x602   : > { %v1578_v35 = vsel %vm349_vm0, %v1569_v34, %v2853_v22  ;;  %v2704_v34 = vpack.c.bf16 %v1723_v59, %v1721_v58  ;;  %v1736_v22 = vld [vmem:[%s3899_s3 + $0xf8] sm:$0xff] }
 0x603   : > { %2216 = vmatmul.mubr.msk.f32.vlgmr.msra.gmra.mrb[8].mxu0 %vm864_vm4, %v1578_v35  ;;  %v1735_v35 = vld [vmem:[%s3899_s3 + $0xf0] sm:$0xff] }
 0x604   : > { %2689 = vmatpush1.bf16.msra.mxu0 %v2688_v17  ;;  %1809 = vmatprep.mubr.f32.mxu0 %v3059_v0  ;;  %v1734_v17 = vld [vmem:[%s3899_s3 + $0xe8] sm:$0xff]  ;;  %v2716_v37 = vpack.c.bf16 %v1735_v35, %v1733_v30 }
 0x605   : > { %2691 = vmatprep.subr.bf16.mxu0 %v2690_v24  ;;  %v2712_v24 = vpack.c.bf16 %v1731_v16, %v1729_v11  ;;  %v2714_v29 = vpack.c.bf16 %v1736_v22, %v1734_v17 }
 0x608   : > { %2693 = vmatpush1.bf16.msra.mxu0 %v2692_v43  ;;  %v2860_v43 = vld [vmem:[%s3309_s20 + $0x8] sm:$0xff]  ;;  %s2200_s20 = sshll.u32 %s3305_s21, 5 }
 0x609   : > { %2695 = vmatprep.subr.bf16.mxu0 %v2694_v13  ;;  %s340_s10 = scalar_lea.vmem [#allocation10], %s2200_s20 }
 0x60a   : > { %s2084_s11 = sshll.u32 %s340_s10, 4  ;;  %s3852_s11 = int_to_ptr.vmem [resolvable:$true] %s2084_s11 }
 0x60b   : > { %s2975_s12 = scalar_lea.vmem %s3852_s11, 512  ;;  %p2982_p12 = scmp.lt.s32.totalorder %s3852_s11, %s2980_s17 }
 0x60c   : > { %2697 = vmatpush1.bf16.msra.mxu0 %v2696_v48  ;;  %p2976_p10 = scmp.ne.s32.totalorder %s3852_s11, %s2975_s12  ;;  %p2983_p1 = scmp.lt.s32.totalorder %s2981_s16, %s2975_s12 }
 0x60d   : > { %2699 = vmatprep.subr.bf16.mxu0 %v2698_v57 }
 0x60e   : > { %p2977_p3 = pnand %p2976_p10, %p3257_p5  ;;  %p2984_p2 = por %p2983_p1, %p2982_p12 }
 0x610   : > { %2701 = vmatpush1.bf16.msra.mxu0 %v2700_v39  ;;  %p2978_p7 = pneg %p2977_p3 }
 0x611   : > { %2703 = vmatprep.subr.bf16.mxu0 %v2702_v21 }
 0x612   : > { %p2985_p4 = pnand %p2984_p2, %p2978_p7 }
 0x614   : > { %2705 = vmatpush1.bf16.msra.mxu0 %v2704_v34 }
 0x615   : > { %2707 = vmatprep.subr.bf16.mxu0 %v2706_v42 }
 0x618   : > { %2709 = vmatpush1.bf16.msra.mxu0 %v2708_v7 }
 0x619   : > { %2711 = vmatprep.subr.bf16.mxu0 %v2710_v10 }
 0x61c   : > { %2713 = vmatpush1.bf16.msra.mxu0 %v2712_v24 }
 0x61d   : > { %2715 = vmatprep.subr.bf16.mxu0 %v2714_v29 }
 0x620   : > { %2717 = vmatpush1.bf16.msra.mxu0 %v2716_v37 }
 0x621   : > { %2719 = vmatprep.subr.bf16.mxu0 %v3339_v4 }
 0x623   : > { %1810 = vmatmul.mubr.f32.vlgmr.msra.gmra.mrb[10].mxu0 %v2859_v41 }
 0x624   : > { %1815 = vmatprep.mubr.f32.mxu0 %v3059_v0  ;;  %2721 = vmatpush3.bf16.msra.mxu0 %v3341_v5 }
 0x625   : > { %2723 = vmatprep.subr.bf16.mxu0 %v3350_v8  ;;  %v1739_v8 = vsub.s32 6, %v3496_v25 }
 0x627   : > { %1816 = vmatmul.mubr.f32.gmra.mrb[12].mxu0 %v2860_v43 }
 0x628   : > { %2725 = vmatpush3.bf16.msra.mxu0 %v3364_v18  ;;  %v1740_v18 = vrot.slane %v3626_v50, %v1739_v8 }
 0x629   : > { %2727 = vmatprep.subr.bf16.mxu0 %v3394_v46 }
 0x62c   : > { %2729 = vmatpush3.bf16.msra.mxu0 %v3402_v49  ;;  %v1744_v49 = vrot.slane %v3629_v33, %v1739_v8 }
 0x62d   : > { %2731 = vmatprep.subr.bf16.mxu0 %v3412_v52 }
 0x630   : > { %2733 = vmatpush3.bf16.msra.mxu0 %v3420_v55 }
 0x631   : > { %2735 = vmatprep.subr.bf16.mxu0 %v3430_v60 }
 0x634   : > { %2737 = vmatpush3.bf16.msra.mxu0 %v3438_v63 }
 0x635   : > { %2739 = vmatprep.subr.bf16.mxu0 %v3448_v3 }
 0x638   : > { %2741 = vmatpush3.bf16.msra.mxu0 %v3456_v9 }
 0x639   : > { %2743 = vmatprep.subr.bf16.mxu0 %v3468_v14 }
 0x63c   : > { %2745 = vmatpush3.bf16.msra.mxu0 %v3480_v19 }
 0x63d   : > { %2747 = vmatprep.subr.bf16.mxu0 %v3483_v20 }
 0x640   : > { %2749 = vmatpush3.bf16.msra.mxu0 %v3492_v23 }
 0x641   : > { %2217 = vmatprep.subr.msk.mxu0 %vm868_vm3, %v3534_v32 }
 0x6d6   : > { %v3782_v4 = vpop.f32.mrb[8].mxu0 }
 0x6d7   : > { %v3784_v5 = vpop.f32.mrb[9].mxu0 }
 0x6f6   : > { %v1811_v46 = vpop.f32.mrb[10].mxu0 }
 0x6f7   : > { %v1813_v52 = vpop.f32.mrb[11].mxu0  ;;  %v3789_v55 = vadd.f32 %v1811_v46, %v1740_v18 }
 0x6f8   : > { %v3791_v60 = vadd.f32 %v1813_v52, %v1744_v49 }
 0x6f9   : > { %v1836_v19 = vmul.f32 %v3789_v55, %v3789_v55 }
 0x6fa   : > { %v1817_v63 = vpop.f32.mrb[12].mxu0  ;;  %v1837_v32 = vmul.f32 %v3791_v60, %v3791_v60 }
 0x6fb   : > { %v3793_v3 = vadd.f32 %v1817_v63, %v1740_v18  ;;  %v1819_v9 = vpop.f32.mrb[13].mxu0 }
 0x6fc   : > { %v3795_v14 = vadd.f32 %v1819_v9, %v1744_v49 }
 0x6fd   : > { %v1822_v20 = vadd.f32 %v3793_v3, %v3789_v55  ;;  %v1838_v23 = vmul.f32 %v3793_v3, %v3793_v3 }
 0x6fe   : > { %v1829_v13 = vadd.f32 %v3795_v14, %v3791_v60  ;;  %v1839_v44 = vmul.f32 %v3795_v14, %v3795_v14 }
 0x6ff   : > { %v1823_v45 = vrot.slane %v1822_v20, 4  ;;  %v1840_v12 = vadd.f32 %v1838_v23, %v1836_v19  ;;  %v1679_v19 = vsub.s32 4, %v3496_v25 }
 0x700   : > { %v1830_v47 = vrot.slane %v1829_v13, 4  ;;  %v1847_v48 = vadd.f32 %v1839_v44, %v1837_v32  ;;  %v1668_v32 = vrot.slane %v3782_v4, %v3560_v31 }
 0x701   : > { %v1824_v57 = vadd.f32 %v1823_v45, %v1822_v20  ;;  %v1841_v27 = vrot.slane %v1840_v12, 4 }
 0x702   : > { %v1831_v56 = vadd.f32 %v1830_v47, %v1829_v13  ;;  %v1848_v51 = vrot.slane %v1847_v48, 4  ;;  %v1672_v13 = vrot.slane %v3784_v5, %v3560_v31 }
 0x703   : > { %v1825_v53 = vrot.slane %v1824_v57, 2  ;;  %v1842_v39 = vadd.f32 %v1841_v27, %v1840_v12  ;;  %v1680_v12 = vrot.slane %v3626_v50, %v1679_v19 }
 0x704   : > { %v1832_v21 = vrot.slane %v1831_v56, 2  ;;  %v1849_v58 = vadd.f32 %v1848_v51, %v1847_v48  ;;  %v1684_v48 = vrot.slane %v3629_v33, %v1679_v19 }
 0x705   : > { %v1826_v59 = vadd.f32 %v1825_v53, %v1824_v57  ;;  %v1843_v61 = vrot.slane %v1842_v39, 2 }
 0x706   : > { %v1833_v62 = vadd.f32 %v1832_v21, %v1831_v56  ;;  %v1850_v34 = vrot.slane %v1849_v58, 2 }
 0x707   : > { %v1844_v42 = vadd.f32 %v1843_v61, %v1842_v39  ;;  %v1827_v2 = vrot.slane %v1826_v59, 1 }
 0x708   : > { %v1834_v1 = vrot.slane %v1833_v62, 1  ;;  %v1851_v38 = vadd.f32 %v1850_v34, %v1849_v58 }
 0x709   : > { %v1845_v6 = vrot.slane %v1844_v42, 1  ;;  %v1828_v17 = vadd.f32 %v1827_v2, %v1826_v59 }
 0x70a   : > { %v1852_v7 = vrot.slane %v1851_v38, 1  ;;  %v1835_v11 = vadd.f32 %v1834_v1, %v1833_v62 }
 0x70b   : > { %v1846_v10 = vadd.f32 %v1845_v6, %v1844_v42 }
 0x70c   : > { %v1853_v16 = vadd.f32 %v1852_v7, %v1851_v38 }
 0x70d   : > { %v1854_v24 = vsel %vm349_vm0, %v1828_v17, %v1846_v10  ;;  %v2221_v17 = vld [vmem:[#allocation8 + $0x18] ss:$0 sm:$0xff] }
 0x70e   : > { %v1855_v22 = vsel %vm349_vm0, %v1835_v11, %v1853_v16 }
 0x70f   : > { %1920 = vmatprep.mubr.f32.mxu0 %v1855_v22 }
 0x710   : > { %1921 = vmatmul.mubr.f32.vlgmr.msra.gmra.mrb[14].mxu0 %v1854_v24 }
 0x711   : > { %2218 = vmatpush1.msk.msra.mxu0 %vm868_vm3, %v3657_v40  ;;  %2003 = vmatprep.mubr.f32.mxu0 %v3059_v0  ;;  %v1656_v40 = vrot.slane %v3782_v4, %v3499_v26  ;;  %v1660_v0 = vrot.slane %v3784_v5, %v3499_v26 }
 0x713   : > { %v1661_v63 = vsub.f32 %v3632_v36, %v1656_v40  ;;  %v1663_v9 = vsub.f32 %v3636_v15, %v1656_v40  ;;  %v1662_v20 = vsub.f32 %v3634_v28, %v1660_v0  ;;  %v1664_v23 = vsub.f32 %v3638_v54, %v1660_v0 }
 0x714   : > { %v1691_v36 = vsub.s32 5, %v3496_v25  ;;  %v2036_v28 = vsub.s32 7, %v3496_v25 }
 0x715   : > { %v1673_v44 = vmul.f32 %v1668_v32, %v1661_v63  ;;  %v1675_v45 = vmul.f32 %v1668_v32, %v1663_v9  ;;  %v1674_v47 = vmul.f32 %v1672_v13, %v1662_v20  ;;  %v1676_v15 = vmul.f32 %v1672_v13, %v1664_v23 }
 0x716   : > { %v1692_v4 = vrot.slane %v3626_v50, %v1691_v36  ;;  %v1696_v39 = vrot.slane %v3629_v33, %v1691_v36  ;;  %v2037_v61 = vrot.slane %v3626_v50, %v2036_v28  ;;  %v2041_v1 = vrot.slane %v3629_v33, %v2036_v28 }
 0x717   : > { %v1685_v57 = vmul.f32 %v1680_v12, %v1673_v44  ;;  %v1687_v27 = vmul.f32 %v1680_v12, %v1675_v45  ;;  %v1686_v51 = vmul.f32 %v1684_v48, %v1674_v47  ;;  %v1688_v53 = vmul.f32 %v1684_v48, %v1676_v15 }
 0x719   : > { %v1697_v38 = vadd.f32 %v1692_v4, %v1685_v57  ;;  %v1699_v2 = vadd.f32 %v1692_v4, %v1687_v27  ;;  %v1700_v7 = vadd.f32 %v1696_v39, %v1688_v53 }
 0x71b   : > { %v1703_v24 = vmax.f32 %v1699_v2, 0.0 }
 0x7e3   : > { %v2331_v29 = vpop.f32.mrb[14].mxu0 }
 0x7e4   : > { %v2332_v30 = vpop.f32.mrb[15].mxu0 }
 0x7e5   : > { %v2333_v35 = vadd.f32 %v2332_v30, %v2331_v29  ;;  %v1704_v30 = vmax.f32 %v1700_v7, 0.0 }
 0x7e7   : > { %v1926_v37 = vmul.f32 0.00048828125, %v2333_v35 }
 0x7e9   : > { %v1927_v41 = vmul.f32 %v1926_v37, %v1926_v37 }
 0x7eb   : > { %v1929_v43 = vrot.slane %v1927_v41, 7 }
 0x7ed   : > { %v1931_v8 = vsub.f32 %v1926_v37, %v1929_v43 }
 0x7ef   : > { %v1932_v18 = vmax.f32 %v1931_v8, 0.0 }
 0x7f1   : > { %v1933_v46 = vadd.f32 1e-05, %v1932_v18 }
 0x7f3   : > { %2854 = vrsqrt.f32 %v1933_v46 }
 0x7fd   : > { %v2855_v49 = vpop.eup %2854 }
 0x7fe   : > { %v1935_v52 = vsel %vm349_vm0, %v1926_v37, %v2855_v49 }
 0x7ff   : > { %2219 = vmatmul.mubr.msk.f32.vlgmr.msra.gmra.mrb[16].mxu0 %vm864_vm4, %v1935_v52 }
 0x8d2   : > { %v2005_v54 = vpop.f32.mrb[16].mxu0 }
 0x8d3   : > { %v2013_v5 = vrot.slane %v2005_v54, %v3499_v26  ;;  %v2007_v56 = vpop.f32.mrb[17].mxu0  ;;  %v2025_v25 = vrot.slane %v2005_v54, %v3560_v31 }
 0x8d4   : > { %v2017_v21 = vrot.slane %v2007_v56, %v3499_v26  ;;  %v2029_v42 = vrot.slane %v2007_v56, %v3560_v31 }
 0x8d5   : > { %v2018_v58 = vsub.f32 %v3789_v55, %v2013_v5  ;;  %v2020_v59 = vsub.f32 %v3793_v3, %v2013_v5  ;;  %v1698_v55 = vadd.f32 %v1696_v39, %v1686_v51  ;;  %v2220_v3 = vld [vmem:[#allocation8 + $0x10] ss:$0 sm:$0xff] }
 0x8d6   : > { %v2019_v62 = vsub.f32 %v3791_v60, %v2017_v21  ;;  %v2021_v34 = vsub.f32 %v3795_v14, %v2017_v21  ;;  %v1701_v14 = vmax.f32 %v1697_v38, 0.0 }
 0x8d7   : > { %v2030_v26 = vmul.f32 %v2025_v25, %v2018_v58  ;;  %v2032_v6 = vmul.f32 %v2025_v25, %v2020_v59  ;;  %v1702_v33 = vmax.f32 %v1698_v55, 0.0 }
 0x8d8   : > { %v2031_v10 = vmul.f32 %v2029_v42, %v2019_v62  ;;  %v2033_v11 = vmul.f32 %v2029_v42, %v2021_v34 }
 0x8d9   : > { %v2042_v50 = vmul.f32 %v2037_v61, %v2030_v26  ;;  %v2044_v16 = vmul.f32 %v2037_v61, %v2032_v6 }
 0x8da   : > { %v2043_v60 = vmul.f32 %v2041_v1, %v2031_v10  ;;  %v2045_v22 = vmul.f32 %v2041_v1, %v2033_v11 }
 0x8db   : > { %v2054_v31 = vadd.f32 %v2220_v3, %v2042_v50  ;;  %v2056_v29 = vadd.f32 %v2220_v3, %v2044_v16 }
 0x8dc   : > { %v2055_v35 = vadd.f32 %v2221_v17, %v2043_v60  ;;  %v2057_v37 = vadd.f32 %v2221_v17, %v2045_v22 }
 0x8dd   : > { %v2058_v41 = vadd.f32 %v2054_v31, %v1701_v14  ;;  %v2060_v43 = vadd.f32 %v2056_v29, %v1703_v24 }
 0x8de   : > { %v2059_v8 = vadd.f32 %v2055_v35, %v1702_v33  ;;  %v2061_v18 = vadd.f32 %v2057_v37, %v1704_v30 }
 0x8df   : > { %v2062_v46 = vmax.f32 %v2058_v41, 0.0  ;;  %v2064_v49 = vmax.f32 %v2060_v43, 0.0 }
 0x8e0   : > { %v2063_v52 = vmax.f32 %v2059_v8, 0.0  ;;  %v2065_v40 = vmax.f32 %v2061_v18, 0.0 }
 0x8e1   : > { %2066 = vst [vmem:[%s340_s10] sm:$0xff] %v2062_v46  ;;  %2068 = vst [vmem:[%s340_s10 + $0x10] sm:$0xff] %v2064_v49 }
 0x8e2   : > { %2067 = vst [vmem:[%s340_s10 + $0x8] sm:$0xff] %v2063_v52  ;;  %2069 = vst [vmem:[%s340_s10 + $0x18] sm:$0xff] %v2065_v40 }
 0x8e3   : > { %2988 = shalt.err (!%p2985_p4)
}
 0x8e4   : > { %s2989_s13 = scalar_lea.hbm %s3850_s29, 512  ;;  %s2993_s20 = scalar_lea.hbm %s3903_s7, 1024 }
 0x8e5   : > { %p2990_p9 = scmp.ne.s32.totalorder %s3850_s29, %s2989_s13  ;;  %p2994_p8 = scmp.lt.u32.totalorder %s3850_s29, %s3903_s7 }
 0x8e6   : > { %p2995_p13 = scmp.lt.u32.totalorder %s2993_s20, %s2989_s13  ;;  %p2997_p10 = scmp.lt.u32.totalorder %s2989_s13, %s3850_s29 }
 0x8e7   : > { %p2991_p0 = pnand %p2990_p9, %p3257_p5 }
 0x8e8   : > { %p2996_p6 = por %p2995_p13, %p2994_p8 }
 0x8e9   : > { %p2992_p11 = pneg %p2991_p0 }
 0x8ea   : > { %p2998_p3 = por %p2997_p10, %p2996_p6 }
 0x8ec   : > { %p2999_p7 = pnand %p2998_p3, %p2992_p11 }
 0x8ee   : > { %3002 = shalt.err (!%p2999_p7)
}
 0x8ef   : > { %s3061_s14 = smov 256   ;;  %s3062_s15 = smov 16  }
 0x8f0   : > { %2780 = dma.vmem_to_hbm [thread:$0]  (%p3257_p5), %s3852_s11, 512, %s3850_s29, %s2071_s28, %s3061_s14, %s3061_s14, %s3062_s15  }
 0x8f1 PF: > { %s3925_s12 = sld [smem:[#allocation15_spill]]  ;;  %s2099_s8 = sand.u32 1, %s3037_s24  }
 0x8f2   : > { %p3927_p1 = scmp.ge.s32.totalorder %s3049_s27, 2  ;;  %s2100_s17 = scalar_lea.sflag [#allocation4], %s2099_s8 }
 0x8f7   : > { %p3926_p12 = scmp.ne.s32.totalorder %s3925_s12, 0 }
 0x8f9   : > { %p2797_p2 = pnand %p3927_p1, %p3926_p12 }
 0x8fb   : > { %3032 = dma.done.wait (!%p2797_p2), %s2100_s17, 512  }
 0x8fc   : > { %3034 = vsyncadd (!%p2797_p2), %s2100_s17, 4294966784  ;;  %p22_p4 = scmp.ge.s32.totalorder %s3243_s22, 4   ;;  %s3928_s24 = smov %s3041_s25 }
 0x8fd   : > { %s3929_s25 = smov %s3045_s26  ;;  %s3930_s26 = smov %s3253_s18 }
 0x8fe   : > { %s3931_s27 = smov %s3243_s22  ;;  %24 = sbr.rel (!%p22_p4) target bundleno = 7 (0x7), region = 109 }
 0x905   :  { %2105 = vsyncpa [#allocation3], 1 }
 0x906   :  { %2107 = vsyncpa [#allocation3 + $0x1], 1 }
 0x907   :  { %2108 = vsyncpa [#allocation6], 1 }
 0x908   :  { %2109 = vsyncpa [#allocation9], 1 }
 0x909   :  { %2110 = vsyncpa [#allocation4], 1 }
 0x90a   :  { %2112 = vsyncpa [#allocation4 + $0x1], 1 }

</bundles_post_ra>
